<compile_context>
chip_gen: v7x
topology: tpu7x:2x2x1
jax: 0.10.0
libtpu: 0.0.40
codegen_flags: <defaults>
</compile_context>

<pallas_src>
import functools

import jax
import jax.numpy as jnp
from jax.experimental import pallas as pl
from jax.experimental.pallas import tpu as pltpu


_LANE = 128                       # feature dims padded to 128 lanes (lane-dense MXU)
_MAX_TILE = 512                   # node-row / reduction tile cap
_VMEM_LIMIT = 48 * 1024 * 1024    # headroom under v7x's 64 MiB; raise toward ~100 MiB on v5e/v6e


def _round_up(x, m):
    return (x + m - 1) // m * m


def _pad2(a, rows, cols):
    r, c = a.shape
    return jnp.pad(a, ((0, rows - r), (0, cols - c)))


def choose_tile(n):
    """Node-row / reduction tile size.

    Large tiles (up to 512) amortize the per-grid-step overhead and keep the kernels
    HBM-bound instead of overhead-bound; capping at ceil(n/128)/2 blocks keeps at least
    two row tiles so the 'parallel' row axis can shard across v7x's two TensorCores.
    """
    blocks = max(1, -(-n // _LANE))                       # ceil(n / 128)
    t_blocks = min(_MAX_TILE // _LANE, max(1, (blocks + 1) // 2))
    return t_blocks * _LANE


# ----------------------------- Pallas kernels ------------------------------ #

def _feature_transform_kernel(x_ref, w_ref, out_ref):
    """out[i] = X[i] @ W0  (row-tiled, bf16 in, f32 MXU accumulate, bf16 out)."""
    out_ref[...] = jnp.dot(
        x_ref[...], w_ref[...], preferred_element_type=jnp.float32
    ).astype(out_ref.dtype)


def _layer0_fused_kernel(ahat_ref, feat_ref, b_ref, mask_ref, w1_ref, out_ref, acc_ref):
    """Layer-0 aggregation fused with dropout and the layer-1 feature transform.

        acc[i]  = b0 + sum_k A_hat[i, k] @ (X W0)[k]      (f32 accumulator)
        out[i]  = (relu(acc[i]) * mask[i]) @ W1           (emitted on last k step)

    (X W0) is VMEM-resident (constant index_map) and sliced per K step in-kernel, so it is
    DMA'd from HBM exactly once instead of once per row tile.
    """
    k = pl.program_id(1)
    tk = ahat_ref.shape[1]

    @pl.when(k == 0)
    def _init():
        acc_ref[...] = jnp.broadcast_to(b_ref[...], acc_ref.shape)

    off = pl.multiple_of(k * tk, tk)
    acc_ref[...] += jnp.dot(
        ahat_ref[...], feat_ref[pl.ds(off, tk), :],
        preferred_element_type=jnp.float32)

    @pl.when(k == pl.num_programs(1) - 1)
    def _finalize():
        h = jnp.maximum(acc_ref[...], 0.0) * mask_ref[...].astype(jnp.float32)
        out_ref[...] = jnp.dot(
            h.astype(w1_ref.dtype), w1_ref[...],
            preferred_element_type=jnp.float32).astype(out_ref.dtype)


def _layer1_kernel(ahat_ref, feat_ref, b_ref, out_ref, acc_ref):
    """Layer-1 aggregation: out[i] = relu(b1 + sum_k A_hat[i, k] @ (h W1)[k]); (h W1) resident."""
    k = pl.program_id(1)
    tk = ahat_ref.shape[1]

    @pl.when(k == 0)
    def _init():
        acc_ref[...] = jnp.broadcast_to(b_ref[...], acc_ref.shape)

    off = pl.multiple_of(k * tk, tk)
    acc_ref[...] += jnp.dot(
        ahat_ref[...], feat_ref[pl.ds(off, tk), :],
        preferred_element_type=jnp.float32)

    @pl.when(k == pl.num_programs(1) - 1)
    def _finalize():
        out_ref[...] = jnp.maximum(acc_ref[...], 0.0).astype(out_ref.dtype)


def _decoder_kernel(zrow_ref, zcol_ref, adj_ref):
    """adj[i, j] = sigmoid(z[i] @ z[j]^T); column-z is VMEM-resident and sliced by j."""
    j = pl.program_id(1)
    tj = adj_ref.shape[1]
    off = pl.multiple_of(j * tj, tj)
    zcol = zcol_ref[pl.ds(off, tj), :]
    logits = jax.lax.dot_general(
        zrow_ref[...], zcol,
        dimension_numbers=(((1,), (1,)), ((), ())),
        preferred_element_type=jnp.float32)
    adj_ref[...] = jax.nn.sigmoid(logits).astype(adj_ref.dtype)


# ------------------------------- Wrappers ---------------------------------- #

def normalize_adj(adj):
    """DGL GraphConv norm='both' (no self loops): D^{-1/2} A D^{-1/2}, degree clamped >= 1."""
    deg = jnp.maximum(jnp.sum(adj, axis=1), 1.0)
    d = deg ** -0.5
    return d[:, None] * adj * d[None, :]


def pad_ahat(ahat, tile):
    """Pad + bf16-cast A_hat once, outside the per-forward jitted path (A_hat is reused)."""
    n = ahat.shape[0]
    n_p = _round_up(n, tile)
    return _pad2(ahat, n_p, n_p).astype(jnp.bfloat16)


def gcn_forward(ahat_p, x, w0, b0, w1, b1, mask1, *, tile):
    """sigmoid(z z^T)  with  z = relu(A_hat h W1 + b1),  h = dropout(relu(A_hat X W0 + b0)).

    `ahat_p` must already be zero-padded to a multiple of `tile` and cast to bf16
    (see `pad_ahat`). The returned adjacency is padded — slice [:n, :n] outside.
    """
    n_p = ahat_p.shape[0]
    assert ahat_p.shape == (n_p, n_p) and n_p % tile == 0
    n, in_dim = x.shape
    h1, h2 = w0.shape[1], w1.shape[1]

    fi_p = _round_up(in_dim, _LANE)
    h1_p = _round_up(h1, _LANE)
    h2_p = _round_up(h2, _LANE)

    f32, bf16 = jnp.float32, jnp.bfloat16

    # Zero-pad the small per-layer operands (padded lanes/rows stay exactly 0 through relu).
    x_p = _pad2(x, n_p, fi_p).astype(bf16)
    w0_p = _pad2(w0, fi_p, h1_p).astype(bf16)
    w1_p = _pad2(w1, h1_p, h2_p).astype(bf16)
    b0_p = _pad2(b0.reshape(1, -1), 1, h1_p).astype(f32)
    b1_p = _pad2(b1.reshape(1, -1), 1, h2_p).astype(f32)
    m1_p = _pad2(mask1, n_p, h1_p).astype(bf16)     # inverted-dropout mask, streamed as bf16

    nr = n_p // tile
    nk = n_p // tile

    params_row = pltpu.CompilerParams(
        dimension_semantics=("parallel",), vmem_limit_bytes=_VMEM_LIMIT)
    params_red = pltpu.CompilerParams(
        dimension_semantics=("parallel", "arbitrary"), vmem_limit_bytes=_VMEM_LIMIT)
    params_2d = pltpu.CompilerParams(
        dimension_semantics=("parallel", "parallel"), vmem_limit_bytes=_VMEM_LIMIT)

    # K1: XW0 = X @ W0  (row-tiled; W0 resident).
    xw0 = pl.pallas_call(
        _feature_transform_kernel,
        out_shape=jax.ShapeDtypeStruct((n_p, h1_p), bf16),
        grid=(nr,),
        in_specs=[pl.BlockSpec((tile, fi_p), lambda i: (i, 0)),
                  pl.BlockSpec((fi_p, h1_p), lambda i: (0, 0))],
        out_specs=pl.BlockSpec((tile, h1_p), lambda i: (i, 0)),
        compiler_params=params_row,
    )(x_p, w0_p)

    # K2: HW1 = (relu(A_hat @ XW0 + b0) * mask) @ W1
    #     A_hat streamed (row x K tiles); XW0 / b0 / W1 VMEM-resident; f32 accumulator.
    hw1 = pl.pallas_call(
        _layer0_fused_kernel,
        out_shape=jax.ShapeDtypeStruct((n_p, h2_p), bf16),
        grid=(nr, nk),
        in_specs=[
            pl.BlockSpec((tile, tile), lambda i, k: (i, k)),      # A_hat tile (streamed)
            pl.BlockSpec((n_p, h1_p), lambda i, k: (0, 0)),       # X W0 (resident)
            pl.BlockSpec((1, h1_p), lambda i, k: (0, 0)),         # b0
            pl.BlockSpec((tile, h1_p), lambda i, k: (i, 0)),      # dropout mask row tile
            pl.BlockSpec((h1_p, h2_p), lambda i, k: (0, 0)),      # W1 (resident)
        ],
        out_specs=pl.BlockSpec((tile, h2_p), lambda i, k: (i, 0)),
        scratch_shapes=[pltpu.VMEM((tile, h1_p), f32)],
        compiler_params=params_red,
    )(ahat_p, xw0, b0_p, m1_p, w1_p)

    # K3: z = relu(A_hat @ HW1 + b1)   (HW1 resident, sliced per K step in-kernel).
    z = pl.pallas_call(
        _layer1_kernel,
        out_shape=jax.ShapeDtypeStruct((n_p, h2_p), bf16),
        grid=(nr, nk),
        in_specs=[
            pl.BlockSpec((tile, tile), lambda i, k: (i, k)),
            pl.BlockSpec((n_p, h2_p), lambda i, k: (0, 0)),
            pl.BlockSpec((1, h2_p), lambda i, k: (0, 0)),
        ],
        out_specs=pl.BlockSpec((tile, h2_p), lambda i, k: (i, 0)),
        scratch_shapes=[pltpu.VMEM((tile, h2_p), f32)],
        compiler_params=params_red,
    )(ahat_p, hw1, b1_p)

    # K4: adj_rec = sigmoid(z z^T), tiled over the [N, N] output grid; column-z resident;
    #     bf16 output halves the dominant store traffic.
    adj = pl.pallas_call(
        _decoder_kernel,
        out_shape=jax.ShapeDtypeStruct((n_p, n_p), bf16),
        grid=(nr, nr),
        in_specs=[pl.BlockSpec((tile, h2_p), lambda i, j: (i, 0)),
                  pl.BlockSpec((n_p, h2_p), lambda i, j: (0, 0))],
        out_specs=pl.BlockSpec((tile, tile), lambda i, j: (i, j)),
        compiler_params=params_2d,
    )(z, z)

    return adj


# --------------------------------- Main ------------------------------------ #

if __name__ == "__main__":
    N = 256          # nodes (2 row tiles x 2 K tiles -> exercises pipelining + accumulator)
    IN_DIM = 48
    HIDDEN1 = 64
    HIDDEN2 = 32
    DROPOUT = 0.1

    key = jax.random.PRNGKey(0)
    k_adj, k_feat, kw0, kw1, kb0, kb1, k_mask = jax.random.split(key, 7)

    # Random symmetric adjacency (no self loops) + symmetric normalization.
    upper = (jax.random.uniform(k_adj, (N, N)) < 0.05).astype(jnp.float32)
    adj = jnp.triu(upper, k=1)
    adj = adj + adj.T
    ahat = normalize_adj(adj)

    # Node features.
    x = jax.random.normal(k_feat, (N, IN_DIM), jnp.float32)

    # Glorot-uniform weights (DGL GraphConv default) + small nonzero biases.
    def glorot(k, fan_in, fan_out):
        limit = (6.0 / (fan_in + fan_out)) ** 0.5
        return jax.random.uniform(k, (fan_in, fan_out), jnp.float32, -limit, limit)

    w0 = glorot(kw0, IN_DIM, HIDDEN1)
    w1 = glorot(kw1, HIDDEN1, HIDDEN2)
    b0 = 0.1 * jax.random.normal(kb0, (HIDDEN1,), jnp.float32)
    b1 = 0.1 * jax.random.normal(kb1, (HIDDEN2,), jnp.float32)

    # Training-mode inverted dropout mask (nn.Dropout between the two GraphConv layers).
    keep = 1.0 - DROPOUT
    mask1 = (jax.random.uniform(k_mask, (N, HIDDEN1)) < keep).astype(jnp.float32) / keep

    # Tile selection + one-time A_hat pad / bf16 cast, hoisted out of the jitted forward.
    tile = choose_tile(N)
    ahat_p = jax.block_until_ready(pad_ahat(ahat, tile))

    fwd = jax.jit(functools.partial(gcn_forward, tile=tile))
    adj_rec_p = jax.block_until_ready(fwd(ahat_p, x, w0, b0, w1, b1, mask1))
    adj_rec = jnp.asarray(adj_rec_p[:N, :N], jnp.float32)

    # Pure-JAX f32 reference for correctness.
    h_ref = jnp.maximum(ahat @ (x @ w0) + b0[None, :], 0.0) * mask1
    z_ref = jnp.maximum(ahat @ (h_ref @ w1) + b1[None, :], 0.0)
    adj_ref = jax.nn.sigmoid(z_ref @ z_ref.T)

    assert adj_rec.shape == (N, N)
    assert bool(jnp.all(jnp.isfinite(adj_rec)))
    assert bool(jnp.all((adj_rec >= 0.0) & (adj_rec <= 1.0)))
    max_err = float(jnp.max(jnp.abs(adj_rec - adj_ref)))
    assert max_err < 3e-2, f"max abs err vs f32 reference: {max_err}"
    print("KERNEL_OK")
</pallas_src>

<mosaic_0001>
module attributes {stable_mosaic.version = 11 : i64} {
  func.func @_feature_transform_kernel(%arg0: i32, %arg1: memref<128x128xbf16, #tpu.memory_space<vmem>>, %arg2: memref<128x128xbf16, #tpu.memory_space<vmem>>, %arg3: memref<128x128xbf16, #tpu.memory_space<vmem>>) attributes {dimension_semantics = [#tpu.dimension_semantics<parallel>], iteration_bounds = array<i64: 2>, scalar_prefetch = 0 : i64, scratch_operands = 0 : i64, tpu.core_type = #tpu.core_type<tc>, window_params = [{transform_indices = @transform_0, window_bounds = array<i64: 128, 128>}, {pipeline_mode = #tpu.pipeline_mode<synchronous>, transform_indices = @transform_1, window_bounds = array<i64: 128, 128>}, {transform_indices = @transform_2, window_bounds = array<i64: 128, 128>}]} {
    %c0 = arith.constant 0 : index
    %c0_0 = arith.constant 0 : index
    %0 = vector.load %arg1[%c0, %c0_0] : memref<128x128xbf16, #tpu.memory_space<vmem>>, vector<128x128xbf16>
    %c0_1 = arith.constant 0 : index
    %c0_2 = arith.constant 0 : index
    %1 = vector.load %arg2[%c0_1, %c0_2] : memref<128x128xbf16, #tpu.memory_space<vmem>>, vector<128x128xbf16>
    %cst = arith.constant dense<0.000000e+00> : vector<128x128xf32>
    %2 = tpu.matmul %0, %1, %cst {dimension_numbers = #tpu.dot_dimension_numbers<[1], [0], [0], [1], [0, 0, 1, 1], [], []>} : vector<128x128xbf16>, vector<128x128xbf16>, vector<128x128xf32> -> vector<128x128xf32>
    %3 = arith.truncf %2 : vector<128x128xf32> to vector<128x128xbf16>
    %c0_3 = arith.constant 0 : index
    %c0_4 = arith.constant 0 : index
    %4 = vector.load %arg3[%c0_3, %c0_4] : memref<128x128xbf16, #tpu.memory_space<vmem>>, vector<128x128xbf16>
    tpu.vector_store %arg3[%c0_3, %c0_4], %3 {strides = array<i32>} : memref<128x128xbf16, #tpu.memory_space<vmem>>, vector<128x128xbf16>,
    return
  }
  func.func @transform_0(%arg0: i32) -> (i32, i32) {
    %c0_i32 = arith.constant 0 : i32
    %c0_i32_0 = arith.constant 0 : i32
    return %arg0, %c0_i32 : i32, i32
  }
  func.func @transform_1(%arg0: i32) -> (i32, i32) {
    %c0_i32 = arith.constant 0 : i32
    %c0_i32_0 = arith.constant 0 : i32
    %c0_i32_1 = arith.constant 0 : i32
    return %c0_i32, %c0_i32_0 : i32, i32
  }
  func.func @transform_2(%arg0: i32) -> (i32, i32) {
    %c0_i32 = arith.constant 0 : i32
    %c0_i32_0 = arith.constant 0 : i32
    return %arg0, %c0_i32 : i32, i32
  }
}

module attributes {stable_mosaic.version = 11 : i64} {
  func.func @_layer0_fused_kernel(%arg0: i32, %arg1: i32, %arg2: memref<128x128xbf16, #tpu.memory_space<vmem>>, %arg3: memref<256x128xbf16, #tpu.memory_space<vmem>>, %arg4: memref<1x128xf32, #tpu.memory_space<vmem>>, %arg5: memref<128x128xbf16, #tpu.memory_space<vmem>>, %arg6: memref<128x128xbf16, #tpu.memory_space<vmem>>, %arg7: memref<128x128xbf16, #tpu.memory_space<vmem>>, %arg8: memref<128x128xf32, #tpu.memory_space<vmem>>) attributes {dimension_semantics = [#tpu.dimension_semantics<parallel>, #tpu.dimension_semantics<arbitrary>], iteration_bounds = array<i64: 2, 2>, scalar_prefetch = 0 : i64, scratch_operands = 1 : i64, tpu.core_type = #tpu.core_type<tc>, window_params = [{transform_indices = @transform_0, window_bounds = array<i64: 128, 128>}, {pipeline_mode = #tpu.pipeline_mode<synchronous>, transform_indices = @transform_1, window_bounds = array<i64: 256, 128>}, {pipeline_mode = #tpu.pipeline_mode<synchronous>, transform_indices = @transform_2, window_bounds = array<i64: 1, 128>}, {transform_indices = @transform_3, window_bounds = array<i64: 128, 128>}, {pipeline_mode = #tpu.pipeline_mode<synchronous>, transform_indices = @transform_4, window_bounds = array<i64: 128, 128>}, {transform_indices = @transform_5, window_bounds = array<i64: 128, 128>}]} {
    %c0_i32 = arith.constant 0 : i32
    %0 = arith.cmpi eq, %arg1, %c0_i32 : i32
    %1 = arith.extui %0 : i1 to i32
    %c0_i32_0 = arith.constant 0 : i32
    %2 = arith.cmpi ne, %1, %c0_i32_0 : i32
    scf.if %2 {
      %c0_8 = arith.constant 0 : index
      %c0_9 = arith.constant 0 : index
      %15 = vector.load %arg4[%c0_8, %c0_9] : memref<1x128xf32, #tpu.memory_space<vmem>>, vector<1x128xf32>
      %16 = vector.shape_cast %15 : vector<1x128xf32> to vector<1x128xf32>
      %17 = vector.broadcast %16 : vector<1x128xf32> to vector<128x128xf32>
      %c0_10 = arith.constant 0 : index
      %c0_11 = arith.constant 0 : index
      %18 = vector.load %arg8[%c0_10, %c0_11] : memref<128x128xf32, #tpu.memory_space<vmem>>, vector<128x128xf32>
      tpu.vector_store %arg8[%c0_10, %c0_11], %17 {strides = array<i32>} : memref<128x128xf32, #tpu.memory_space<vmem>>, vector<128x128xf32>,
    } else {
    }
    %c128_i32 = arith.constant 128 : i32
    %3 = arith.muli %arg1, %c128_i32 : i32
    %4 = tpu.assume_multiple %3, 128 : i32
    %c0 = arith.constant 0 : index
    %c0_1 = arith.constant 0 : index
    %5 = vector.load %arg8[%c0, %c0_1] : memref<128x128xf32, #tpu.memory_space<vmem>>, vector<128x128xf32>
    %c0_2 = arith.constant 0 : index
    %c0_3 = arith.constant 0 : index
    %6 = vector.load %arg2[%c0_2, %c0_3] : memref<128x128xbf16, #tpu.memory_space<vmem>>, vector<128x128xbf16>
    %7 = arith.index_cast %4 : i32 to index
    %c0_4 = arith.constant 0 : index
    %8 = vector.load %arg3[%7, %c0_4] : memref<256x128xbf16, #tpu.memory_space<vmem>>, vector<128x128xbf16>
    %cst = arith.constant dense<0.000000e+00> : vector<128x128xf32>
    %9 = tpu.matmul %6, %8, %cst {dimension_numbers = #tpu.dot_dimension_numbers<[1], [0], [0], [1], [0, 0, 1, 1], [], []>} : vector<128x128xbf16>, vector<128x128xbf16>, vector<128x128xf32> -> vector<128x128xf32>
    %10 = arith.addf %5, %9 : vector<128x128xf32>
    %c0_5 = arith.constant 0 : index
    %c0_6 = arith.constant 0 : index
    %11 = vector.load %arg8[%c0_5, %c0_6] : memref<128x128xf32, #tpu.memory_space<vmem>>, vector<128x128xf32>
    tpu.vector_store %arg8[%c0_5, %c0_6], %10 {strides = array<i32>} : memref<128x128xf32, #tpu.memory_space<vmem>>, vector<128x128xf32>,
    %c1_i32 = arith.constant 1 : i32
    %12 = arith.cmpi eq, %arg1, %c1_i32 : i32
    %13 = arith.extui %12 : i1 to i32
    %c0_i32_7 = arith.constant 0 : i32
    %14 = arith.cmpi ne, %13, %c0_i32_7 : i32
    scf.if %14 {
      %c0_8 = arith.constant 0 : index
      %c0_9 = arith.constant 0 : index
      %15 = vector.load %arg8[%c0_8, %c0_9] : memref<128x128xf32, #tpu.memory_space<vmem>>, vector<128x128xf32>
      %cst_10 = arith.constant 0.000000e+00 : f32
      %16 = vector.broadcast %cst_10 : f32 to vector<128x128xf32>
      %17 = arith.maximumf %15, %16 : vector<128x128xf32>
      %c0_11 = arith.constant 0 : index
      %c0_12 = arith.constant 0 : index
      %18 = vector.load %arg5[%c0_11, %c0_12] : memref<128x128xbf16, #tpu.memory_space<vmem>>, vector<128x128xbf16>
      %19 = arith.extf %18 : vector<128x128xbf16> to vector<128x128xf32>
      %20 = arith.mulf %17, %19 : vector<128x128xf32>
      %21 = arith.truncf %20 : vector<128x128xf32> to vector<128x128xbf16>
      %c0_13 = arith.constant 0 : index
      %c0_14 = arith.constant 0 : index
      %22 = vector.load %arg6[%c0_13, %c0_14] : memref<128x128xbf16, #tpu.memory_space<vmem>>, vector<128x128xbf16>
      %cst_15 = arith.constant dense<0.000000e+00> : vector<128x128xf32>
      %23 = tpu.matmul %21, %22, %cst_15 {dimension_numbers = #tpu.dot_dimension_numbers<[1], [0], [0], [1], [0, 0, 1, 1], [], []>} : vector<128x128xbf16>, vector<128x128xbf16>, vector<128x128xf32> -> vector<128x128xf32>
      %24 = arith.truncf %23 : vector<128x128xf32> to vector<128x128xbf16>
      %c0_16 = arith.constant 0 : index
      %c0_17 = arith.constant 0 : index
      %25 = vector.load %arg7[%c0_16, %c0_17] : memref<128x128xbf16, #tpu.memory_space<vmem>>, vector<128x128xbf16>
      tpu.vector_store %arg7[%c0_16, %c0_17], %24 {strides = array<i32>} : memref<128x128xbf16, #tpu.memory_space<vmem>>, vector<128x128xbf16>,
    } else {
    }
    return
  }
  func.func @transform_0(%arg0: i32, %arg1: i32) -> (i32, i32) {
    %c0_i32 = arith.constant 0 : i32
    return %arg0, %arg1 : i32, i32
  }
  func.func @transform_1(%arg0: i32, %arg1: i32) -> (i32, i32) {
    %c0_i32 = arith.constant 0 : i32
    %c0_i32_0 = arith.constant 0 : i32
    %c0_i32_1 = arith.constant 0 : i32
    return %c0_i32, %c0_i32_0 : i32, i32
  }
  func.func @transform_2(%arg0: i32, %arg1: i32) -> (i32, i32) {
    %c0_i32 = arith.constant 0 : i32
    %c0_i32_0 = arith.constant 0 : i32
    %c0_i32_1 = arith.constant 0 : i32
    return %c0_i32, %c0_i32_0 : i32, i32
  }
  func.func @transform_3(%arg0: i32, %arg1: i32) -> (i32, i32) {
    %c0_i32 = arith.constant 0 : i32
    %c0_i32_0 = arith.constant 0 : i32
    return %arg0, %c0_i32 : i32, i32
  }
  func.func @transform_4(%arg0: i32, %arg1: i32) -> (i32, i32) {
    %c0_i32 = arith.constant 0 : i32
    %c0_i32_0 = arith.constant 0 : i32
    %c0_i32_1 = arith.constant 0 : i32
    return %c0_i32, %c0_i32_0 : i32, i32
  }
  func.func @transform_5(%arg0: i32, %arg1: i32) -> (i32, i32) {
    %c0_i32 = arith.constant 0 : i32
    %c0_i32_0 = arith.constant 0 : i32
    return %arg0, %c0_i32 : i32, i32
  }
}

module attributes {stable_mosaic.version = 11 : i64} {
  func.func @_decoder_kernel(%arg0: i32, %arg1: i32, %arg2: memref<128x128xbf16, #tpu.memory_space<vmem>>, %arg3: memref<256x128xbf16, #tpu.memory_space<vmem>>, %arg4: memref<128x128xbf16, #tpu.memory_space<vmem>>) attributes {dimension_semantics = [#tpu.dimension_semantics<parallel>, #tpu.dimension_semantics<parallel>], iteration_bounds = array<i64: 2, 2>, scalar_prefetch = 0 : i64, scratch_operands = 0 : i64, tpu.core_type = #tpu.core_type<tc>, window_params = [{transform_indices = @transform_0, window_bounds = array<i64: 128, 128>}, {pipeline_mode = #tpu.pipeline_mode<synchronous>, transform_indices = @transform_1, window_bounds = array<i64: 256, 128>}, {transform_indices = @transform_2, window_bounds = array<i64: 128, 128>}]} {
    %c128_i32 = arith.constant 128 : i32
    %0 = arith.muli %arg1, %c128_i32 : i32
    %1 = tpu.assume_multiple %0, 128 : i32
    %2 = arith.index_cast %1 : i32 to index
    %c0 = arith.constant 0 : index
    %3 = vector.load %arg3[%2, %c0] : memref<256x128xbf16, #tpu.memory_space<vmem>>, vector<128x128xbf16>
    %c0_0 = arith.constant 0 : index
    %c0_1 = arith.constant 0 : index
    %4 = vector.load %arg2[%c0_0, %c0_1] : memref<128x128xbf16, #tpu.memory_space<vmem>>, vector<128x128xbf16>
    %cst = arith.constant dense<0.000000e+00> : vector<128x128xf32>
    %5 = tpu.matmul %4, %3, %cst {dimension_numbers = #tpu.dot_dimension_numbers<[1], [1], [0], [0], [0, 0, 1, 0], [], []>} : vector<128x128xbf16>, vector<128x128xbf16>, vector<128x128xf32> -> vector<128x128xf32>
    %6 = arith.negf %5 : vector<128x128xf32>
    %7 = math.exp %6 : vector<128x128xf32>
    %cst_2 = arith.constant 1.000000e+00 : f32
    %8 = vector.broadcast %cst_2 : f32 to vector<128x128xf32>
    %9 = arith.addf %8, %7 : vector<128x128xf32>
    %10 = arith.divf %8, %9 : vector<128x128xf32>
    %11 = arith.truncf %10 : vector<128x128xf32> to vector<128x128xbf16>
    %c0_3 = arith.constant 0 : index
    %c0_4 = arith.constant 0 : index
    %12 = vector.load %arg4[%c0_3, %c0_4] : memref<128x128xbf16, #tpu.memory_space<vmem>>, vector<128x128xbf16>
    tpu.vector_store %arg4[%c0_3, %c0_4], %11 {strides = array<i32>} : memref<128x128xbf16, #tpu.memory_space<vmem>>, vector<128x128xbf16>,
    return
  }
  func.func @transform_0(%arg0: i32, %arg1: i32) -> (i32, i32) {
    %c0_i32 = arith.constant 0 : i32
    %c0_i32_0 = arith.constant 0 : i32
    return %arg0, %c0_i32 : i32, i32
  }
  func.func @transform_1(%arg0: i32, %arg1: i32) -> (i32, i32) {
    %c0_i32 = arith.constant 0 : i32
    %c0_i32_0 = arith.constant 0 : i32
    %c0_i32_1 = arith.constant 0 : i32
    return %c0_i32, %c0_i32_0 : i32, i32
  }
  func.func @transform_2(%arg0: i32, %arg1: i32) -> (i32, i32) {
    %c0_i32 = arith.constant 0 : i32
    return %arg0, %arg1 : i32, i32
  }
}

module attributes {stable_mosaic.version = 11 : i64} {
  func.func @_layer1_kernel(%arg0: i32, %arg1: i32, %arg2: memref<128x128xbf16, #tpu.memory_space<vmem>>, %arg3: memref<256x128xbf16, #tpu.memory_space<vmem>>, %arg4: memref<1x128xf32, #tpu.memory_space<vmem>>, %arg5: memref<128x128xbf16, #tpu.memory_space<vmem>>, %arg6: memref<128x128xf32, #tpu.memory_space<vmem>>) attributes {dimension_semantics = [#tpu.dimension_semantics<parallel>, #tpu.dimension_semantics<arbitrary>], iteration_bounds = array<i64: 2, 2>, scalar_prefetch = 0 : i64, scratch_operands = 1 : i64, tpu.core_type = #tpu.core_type<tc>, window_params = [{transform_indices = @transform_0, window_bounds = array<i64: 128, 128>}, {pipeline_mode = #tpu.pipeline_mode<synchronous>, transform_indices = @transform_1, window_bounds = array<i64: 256, 128>}, {pipeline_mode = #tpu.pipeline_mode<synchronous>, transform_indices = @transform_2, window_bounds = array<i64: 1, 128>}, {transform_indices = @transform_3, window_bounds = array<i64: 128, 128>}]} {
    %c0_i32 = arith.constant 0 : i32
    %0 = arith.cmpi eq, %arg1, %c0_i32 : i32
    %1 = arith.extui %0 : i1 to i32
    %c0_i32_0 = arith.constant 0 : i32
    %2 = arith.cmpi ne, %1, %c0_i32_0 : i32
    scf.if %2 {
      %c0_8 = arith.constant 0 : index
      %c0_9 = arith.constant 0 : index
      %15 = vector.load %arg4[%c0_8, %c0_9] : memref<1x128xf32, #tpu.memory_space<vmem>>, vector<1x128xf32>
      %16 = vector.shape_cast %15 : vector<1x128xf32> to vector<1x128xf32>
      %17 = vector.broadcast %16 : vector<1x128xf32> to vector<128x128xf32>
      %c0_10 = arith.constant 0 : index
      %c0_11 = arith.constant 0 : index
      %18 = vector.load %arg6[%c0_10, %c0_11] : memref<128x128xf32, #tpu.memory_space<vmem>>, vector<128x128xf32>
      tpu.vector_store %arg6[%c0_10, %c0_11], %17 {strides = array<i32>} : memref<128x128xf32, #tpu.memory_space<vmem>>, vector<128x128xf32>,
    } else {
    }
    %c128_i32 = arith.constant 128 : i32
    %3 = arith.muli %arg1, %c128_i32 : i32
    %4 = tpu.assume_multiple %3, 128 : i32
    %c0 = arith.constant 0 : index
    %c0_1 = arith.constant 0 : index
    %5 = vector.load %arg6[%c0, %c0_1] : memref<128x128xf32, #tpu.memory_space<vmem>>, vector<128x128xf32>
    %c0_2 = arith.constant 0 : index
    %c0_3 = arith.constant 0 : index
    %6 = vector.load %arg2[%c0_2, %c0_3] : memref<128x128xbf16, #tpu.memory_space<vmem>>, vector<128x128xbf16>
    %7 = arith.index_cast %4 : i32 to index
    %c0_4 = arith.constant 0 : index
    %8 = vector.load %arg3[%7, %c0_4] : memref<256x128xbf16, #tpu.memory_space<vmem>>, vector<128x128xbf16>
    %cst = arith.constant dense<0.000000e+00> : vector<128x128xf32>
    %9 = tpu.matmul %6, %8, %cst {dimension_numbers = #tpu.dot_dimension_numbers<[1], [0], [0], [1], [0, 0, 1, 1], [], []>} : vector<128x128xbf16>, vector<128x128xbf16>, vector<128x128xf32> -> vector<128x128xf32>
    %10 = arith.addf %5, %9 : vector<128x128xf32>
    %c0_5 = arith.constant 0 : index
    %c0_6 = arith.constant 0 : index
    %11 = vector.load %arg6[%c0_5, %c0_6] : memref<128x128xf32, #tpu.memory_space<vmem>>, vector<128x128xf32>
    tpu.vector_store %arg6[%c0_5, %c0_6], %10 {strides = array<i32>} : memref<128x128xf32, #tpu.memory_space<vmem>>, vector<128x128xf32>,
    %c1_i32 = arith.constant 1 : i32
    %12 = arith.cmpi eq, %arg1, %c1_i32 : i32
    %13 = arith.extui %12 : i1 to i32
    %c0_i32_7 = arith.constant 0 : i32
    %14 = arith.cmpi ne, %13, %c0_i32_7 : i32
    scf.if %14 {
      %c0_8 = arith.constant 0 : index
      %c0_9 = arith.constant 0 : index
      %15 = vector.load %arg6[%c0_8, %c0_9] : memref<128x128xf32, #tpu.memory_space<vmem>>, vector<128x128xf32>
      %cst_10 = arith.constant 0.000000e+00 : f32
      %16 = vector.broadcast %cst_10 : f32 to vector<128x128xf32>
      %17 = arith.maximumf %15, %16 : vector<128x128xf32>
      %18 = arith.truncf %17 : vector<128x128xf32> to vector<128x128xbf16>
      %c0_11 = arith.constant 0 : index
      %c0_12 = arith.constant 0 : index
      %19 = vector.load %arg5[%c0_11, %c0_12] : memref<128x128xbf16, #tpu.memory_space<vmem>>, vector<128x128xbf16>
      tpu.vector_store %arg5[%c0_11, %c0_12], %18 {strides = array<i32>} : memref<128x128xbf16, #tpu.memory_space<vmem>>, vector<128x128xbf16>,
    } else {
    }
    return
  }
  func.func @transform_0(%arg0: i32, %arg1: i32) -> (i32, i32) {
    %c0_i32 = arith.constant 0 : i32
    return %arg0, %arg1 : i32, i32
  }
  func.func @transform_1(%arg0: i32, %arg1: i32) -> (i32, i32) {
    %c0_i32 = arith.constant 0 : i32
    %c0_i32_0 = arith.constant 0 : i32
    %c0_i32_1 = arith.constant 0 : i32
    return %c0_i32, %c0_i32_0 : i32, i32
  }
  func.func @transform_2(%arg0: i32, %arg1: i32) -> (i32, i32) {
    %c0_i32 = arith.constant 0 : i32
    %c0_i32_0 = arith.constant 0 : i32
    %c0_i32_1 = arith.constant 0 : i32
    return %c0_i32, %c0_i32_0 : i32, i32
  }
  func.func @transform_3(%arg0: i32, %arg1: i32) -> (i32, i32) {
    %c0_i32 = arith.constant 0 : i32
    %c0_i32_0 = arith.constant 0 : i32
    return %arg0, %c0_i32 : i32, i32
  }
}

</mosaic_0001>

<bundles_post_ra>
// kernel: gcn_forward.4
= control target key start
LH: loop header
LB: loop body
LE: loop exit
PB: predicated region body
PF: predicated region fallthrough
CT: control target
= control target key end

     0   :  { %s726_s9 = smov 0   ;;  %s784_s0 = inlined_call_operand.vmem [shape: bf16[256,128], index: 0, kind: input, shape index: {}]   ;;  %s785_s1 = inlined_call_operand.vmem [shape: bf16[128,128], index: 1, kind: input, shape index: {}]   ;;  %s786_s2 = inlined_call_operand.vmem [shape: bf16[256,128], index: 2, kind: output, shape index: {}]  }
   0x1 LB: > { %s509_s10 = sadd.s32 4294967295, %s709_s9   ;;  %p513_p0 = scmp.ge.s32.totalorder %s709_s9, 1  ;;  %s709_s9 = sphi %s726_s9, %s12_s9  }
   0x2   : > { %p113_p1 = scmp.lt.s32.totalorder %s709_s9, 3 }
   0x4   : > { %p114_p2 = pnand %p513_p0, %p113_p1 }
   0x5   : > { %v687_v0 = vld [vmem:[%s785_s1] sm:$0xff] (!%p114_p2)   ;;  %s514_s13 = sshll.u32 (!%p114_p2), %s509_s10, 4  ;;  %v688_v1 = vld [vmem:[%s785_s1 + $0x8] sm:$0xff] (!%p114_p2)   ;;  %v689_v2 = vld [vmem:[%s785_s1 + $0x10] sm:$0xff] (!%p114_p2)  }
   0x6   : > { %117 = sbr.rel (%p114_p2) target bundleno = 264 (0x108), region = 28  ;;  %p136_p3 = scmp.lt.s32.totalorder (!%p114_p2), %s514_s13, 31  ;;  %631 = vmatprep.subr.bf16.mxu0 (!%p114_p2), %v687_v0  ;;  %663 = vmatprep.subr.bf16.mxu1 (!%p114_p2), %v687_v0  ;;  %v690_v3 = vld [vmem:[%s785_s1 + $0x18] sm:$0xff] (!%p114_p2)   ;;  %v691_v6 = vld [vmem:[%s785_s1 + $0x20] sm:$0xff] (!%p114_p2)   ;;  %v692_v7 = vld [vmem:[%s785_s1 + $0x28] sm:$0xff] (!%p114_p2)  }
   0x7   : > { %632 = vmatpush3.bf16.msra.mxu0 (!%p114_p2), %v687_v0  ;;  %671 = vmatpush3.bf16.msra.mxu1 (!%p114_p2), %v687_v0  ;;  %v693_v8 = vld [vmem:[%s785_s1 + $0x30] sm:$0xff] (!%p114_p2)   ;;  %v694_v9 = vld [vmem:[%s785_s1 + $0x38] sm:$0xff] (!%p114_p2)  }
   0x8   : > { %633 = vmatprep.subr.bf16.mxu0 (!%p114_p2), %v688_v1  ;;  %664 = vmatprep.subr.bf16.mxu1 (!%p114_p2), %v688_v1 }
   0xb   : > { %634 = vmatpush3.bf16.msra.mxu0 (!%p114_p2), %v688_v1  ;;  %672 = vmatpush3.bf16.msra.mxu1 (!%p114_p2), %v688_v1 }
   0xc   : > { %635 = vmatprep.subr.bf16.mxu0 (!%p114_p2), %v689_v2  ;;  %665 = vmatprep.subr.bf16.mxu1 (!%p114_p2), %v689_v2 }
   0xd   : > { %s788_s13 = smov (!%p136_p3, %s514_s13), 31 }
   0xe   : > { %s515_s18 = sshll.u32 %s788_s13, 2 }
   0xf   : > { %s751_s21 = scalar_lea.vmem %s784_s0, %s515_s18  ;;  %636 = vmatpush3.bf16.msra.mxu0 %v689_v2  ;;  %673 = vmatpush3.bf16.msra.mxu1 %v689_v2  ;;  %s145_s6 = scalar_lea.vmem %s786_s2, %s515_s18 }
  0x10   : > { %v695_v4 = vld [vmem:[%s751_s21] sm:$0xff]   ;;  %637 = vmatprep.subr.bf16.mxu0 %v690_v3  ;;  %666 = vmatprep.subr.bf16.mxu1 %v690_v3  ;;  %v697_v10 = vld [vmem:[%s751_s21 + $0x8] sm:$0xff]   ;;  %v699_v12 = vld [vmem:[%s751_s21 + $0x10] sm:$0xff]  }
  0x11   : > { %v696_v5 = vld [vmem:[%s751_s21 + $0x20] sm:$0xff]   ;;  %647 = vmatprep.mubr.bf16.mxu0 %v695_v4  ;;  %v698_v11 = vld [vmem:[%s751_s21 + $0x28] sm:$0xff]   ;;  %v700_v13 = vld [vmem:[%s751_s21 + $0x30] sm:$0xff]  }
  0x12   : > { %655 = vmatprep.mubr.bf16.mxu1 %v696_v5  ;;  %v701_v14 = vld [vmem:[%s751_s21 + $0x18] sm:$0xff]  }
  0x13   : > { %638 = vmatpush3.bf16.msra.mxu0 %v690_v3  ;;  %674 = vmatpush3.bf16.msra.mxu1 %v690_v3  ;;  %v702_v15 = vld [vmem:[%s751_s21 + $0x38] sm:$0xff]  }
  0x14   : > { %639 = vmatprep.subr.bf16.mxu0 %v691_v6  ;;  %667 = vmatprep.subr.bf16.mxu1 %v691_v6 }
  0x17   : > { %640 = vmatpush3.bf16.msra.mxu0 %v691_v6  ;;  %675 = vmatpush3.bf16.msra.mxu1 %v691_v6 }
  0x18   : > { %641 = vmatprep.subr.bf16.mxu0 %v692_v7  ;;  %668 = vmatprep.subr.bf16.mxu1 %v692_v7 }
  0x1b   : > { %642 = vmatpush3.bf16.msra.mxu0 %v692_v7  ;;  %676 = vmatpush3.bf16.msra.mxu1 %v692_v7 }
  0x1c   : > { %643 = vmatprep.subr.bf16.mxu0 %v693_v8  ;;  %669 = vmatprep.subr.bf16.mxu1 %v693_v8 }
  0x1f   : > { %644 = vmatpush3.bf16.msra.mxu0 %v693_v8  ;;  %677 = vmatpush3.bf16.msra.mxu1 %v693_v8 }
  0x20   : > { %645 = vmatprep.subr.bf16.mxu0 %v694_v9  ;;  %670 = vmatprep.subr.bf16.mxu1 %v694_v9 }
  0x23   : > { %646 = vmatpush3.bf16.msra.mxu0 %v694_v9  ;;  %678 = vmatpush3.bf16.msra.mxu1 %v694_v9 }
  0x26   : > { %648 = vmatmul.mubr.bf16.vlgmr.msra.gmra.mrb[0].mxu0 %v697_v10  ;;  %656 = vmatmul.mubr.bf16.vlgmr.msra.gmra.mrb[0].mxu1 %v698_v11 }
  0x27   : > { %651 = vmatprep.mubr.bf16.mxu0 %v699_v12  ;;  %659 = vmatprep.mubr.bf16.mxu1 %v700_v13 }
  0x2e   : > { %652 = vmatmul.mubr.bf16.gmra.mrb[4].mxu0 %v701_v14  ;;  %660 = vmatmul.mubr.bf16.gmra.mrb[4].mxu1 %v702_v15 }
  0xf9   : > { %v649_v16 = vpop.f32.mrb[0].mxu0  ;;  %v657_v17 = vpop.f32.mrb[0].mxu1 }
  0xfa   : > { %v310_v18 = vpop.f32.mrb[1].mxu0  ;;  %v342_v19 = vpop.f32.mrb[1].mxu1 }
  0xfb   : > { %v650_v20 = vpop.f32.mrb[2].mxu0  ;;  %v658_v21 = vpop.f32.mrb[2].mxu1 }
  0xfc   : > { %v576_v22 = vpack.c.bf16 %v650_v20, %v649_v16  ;;  %v596_v23 = vpack.c.bf16 %v658_v21, %v657_v17  ;;  %v313_v24 = vpop.f32.mrb[3].mxu0  ;;  %v345_v25 = vpop.f32.mrb[3].mxu1 }
  0xfd   : > { %v571_v26 = vpack.c.bf16 %v313_v24, %v310_v18  ;;  %v591_v27 = vpack.c.bf16 %v345_v25, %v342_v19 }
  0xfe   : > { %608 = vst [vmem:[%s145_s6 + $0x8] sm:$0xff] %v576_v22   ;;  %612 = vst [vmem:[%s145_s6 + $0x28] sm:$0xff] %v596_v23  }
  0xff   : > { %572 = vst [vmem:[%s145_s6] sm:$0xff] %v571_v26   ;;  %611 = vst [vmem:[%s145_s6 + $0x20] sm:$0xff] %v591_v27  }
 0x101   : > { %v653_v28 = vpop.f32.mrb[4].mxu0  ;;  %v661_v29 = vpop.f32.mrb[4].mxu1 }
 0x102   : > { %v326_v30 = vpop.f32.mrb[5].mxu0  ;;  %v358_v31 = vpop.f32.mrb[5].mxu1 }
 0x103   : > { %v654_v32 = vpop.f32.mrb[6].mxu0  ;;  %v662_v33 = vpop.f32.mrb[6].mxu1 }
 0x104   : > { %v586_v34 = vpack.c.bf16 %v654_v32, %v653_v28  ;;  %v606_v35 = vpack.c.bf16 %v662_v33, %v661_v29  ;;  %v329_v36 = vpop.f32.mrb[7].mxu0  ;;  %v361_v37 = vpop.f32.mrb[7].mxu1 }
 0x105   : > { %v581_v38 = vpack.c.bf16 %v329_v36, %v326_v30  ;;  %v601_v39 = vpack.c.bf16 %v361_v37, %v358_v31 }
 0x106   : > { %610 = vst [vmem:[%s145_s6 + $0x18] sm:$0xff] %v586_v34   ;;  %614 = vst [vmem:[%s145_s6 + $0x38] sm:$0xff] %v606_v35  }
 0x107   : > { %609 = vst [vmem:[%s145_s6 + $0x10] sm:$0xff] %v581_v38   ;;  %613 = vst [vmem:[%s145_s6 + $0x30] sm:$0xff] %v601_v39  }
 0x108 PF: > { %s12_s9 = sadd.s32 1, %s709_s9  }
 0x109   : > { %p9_p4 = scmp.ge.s32.totalorder %s12_s9, 4  }
 0x10b   :  { %11 = sbr.rel (!%p9_p4) target bundleno = 1 (0x1), region = 58 }

// kernel: gcn_forward.7
= control target key start
LH: loop header
LB: loop body
LE: loop exit
PB: predicated region body
PF: predicated region fallthrough
CT: control target
= control target key end

     0   :  { %7 = vsyncpa [#allocation3], 0  ;;  %s1296_s0 = inlined_call_operand.vmem [shape: bf16[256,128], index: 0, kind: input, shape index: {}, may-alias: {0,1}]   ;;  %s1297_s1 = inlined_call_operand.vmem [shape: bf16[256,128], index: 1, kind: input, shape index: {}, may-alias: {0,1}]   ;;  %s1298_s2 = inlined_call_operand.hbm [shape: bf16[256,256], index: 2, kind: output, shape index: {}]  }
   0x1   :  { %9 = vsyncpa [#allocation3 + $0x1], 0  ;;  %s1120_s9 = smov 0   ;;  %s1122_s10 = smov 0  }
   0x2   :  { %s1124_s11 = smov 0   ;;  %s1126_s12 = smov 0  }
   0x3   :  { %s1128_s13 = smov 0   ;;  %s1130_s14 = smov 0  }
   0x4   :  { %s1132_s15 = smov 0   ;;  %s1134_s16 = smov 0  }
   0x5 LB: > { %s659_s17 = sadd.s32 4294967295, %s1099_s16   ;;  %s660_s18 = sadd.s32 4294967294, %s1099_s16   ;;  %s1099_s16 = sphi %s1134_s16, %s15_s16   ;;  %s1095_s15 = sphi %s1132_s15, %s1307_s15   ;;  %s1091_s14 = sphi %s1130_s14, %s1306_s14   ;;  %s1087_s13 = sphi %s1128_s13, %s1305_s13   ;;  %s1083_s12 = sphi %s1126_s12, %s1304_s12   ;;  %s1079_s11 = sphi %s1124_s11, %s1303_s11   ;;  %s1075_s10 = sphi %s1122_s10, %s1302_s10   ;;  %s1071_s9 = sphi %s1120_s9, %s1301_s9  }
   0x6   : > { %s24_s19 = sadd.s32 1, %s1091_s14  ;;  %s27_s20 = sadd.s32 1, %s1095_s15 }
   0x7   : > { %p25_p0 = scmp.ge.s32.totalorder %s24_s19, 2  ;;  %p93_p1 = scmp.ne.s32.totalorder %s1079_s11, %s1075_s10 }
   0x8   : > { %p94_p2 = scmp.eq.s32.totalorder %s659_s17, 3  ;;  %p99_p5 = scmp.ne.s32.totalorder %s1075_s10, %s1071_s9 }
   0x9   : > { %s1309_s19 = smov (%p25_p0, %s24_s19), 0  ;;  %s1311_s20 = smov (!%p25_p0, %s27_s20), %s1095_s15 }
   0xa   : > { %s79_s21 = ssub.s32 %s1091_s14, %s1309_s19  ;;  %p1171_p3 = por %p94_p2, %p93_p1 }
   0xb   : > { %p29_p4 = scmp.ge.s32.totalorder %s1311_s20, 2  ;;  %p100_p6 = scmp.eq.s32.totalorder %s660_s18, 3 }
   0xc   : > { %p663_p7 = scmp.ge.s32.totalorder %s1099_s16, 1  ;;  %p130_p9 = scmp.lt.s32.totalorder %s1099_s16, 5 }
   0xd   : > { %s1313_s20 = smov (%p29_p4, %s1311_s20), 0  ;;  %p1180_p8 = por %p100_p6, %p99_p5 }
   0xe   : > { %s78_s24 = ssub.s32 %s1095_s15, %s1313_s20  ;;  %s83_s25 = sadd.s32 1, %s1079_s11 }
   0xf   : > { %s80_s26 = sor.u32 %s79_s21, %s78_s24  ;;  %p131_p10 = pnand %p663_p7, %p130_p9 }
  0x10   : > { %p81_p11 = scmp.eq.s32.totalorder %s80_s26, 0  ;;  %s667_s28 = sshll.u32 (!%p131_p10), %s1083_s12, 7 }
  0x11   : > { %134 = sbr.rel (%p131_p10) target bundleno = 370 (0x172), region = 28  ;;  %s665_s29 = sshll.u32 (!%p131_p10), %s1087_s13, 4 }
  0x12   : > { %s1189_s27 = scalar_select %p81_p11, %s1079_s11, %s83_s25  }
  0x13   : > { %s161_s30 = sshra.s32 (!%p131_p10), %s667_s28, 3  ;;  %p153_p12 = scmp.lt.s32.totalorder (!%p131_p10), %s665_s29, 31 }
  0x14   : > { %s668_s3 = sshll.u32 (!%p131_p10), %s161_s30, 2  ;;  %s149_s21 = sand.u32 (!%p131_p10), 1, %s1075_s10  }
  0x15   : > { %s1196_s6 = scalar_lea.vmem (!%p131_p10), %s1297_s1, %s668_s3  ;;  %s664_s24 = sshll.u32 (!%p131_p10), %s149_s21, 6 }
  0x16   : > { %v925_v0 = vld [vmem:[%s1196_s6] sm:$0xff] (!%p131_p10)   ;;  %v926_v1 = vld [vmem:[%s1196_s6 + $0x8] sm:$0xff] (!%p131_p10)   ;;  %v927_v2 = vld [vmem:[%s1196_s6 + $0x10] sm:$0xff] (!%p131_p10)   ;;  %s1222_s25 = scalar_lea.vmem (!%p131_p10), [#allocation2], %s664_s24  ;;  %s739_s26 = sshll.u32 (!%p131_p10), %s1087_s13, 5 }
  0x17   : > { %803 = vmatprep.subr.bf16.mxu0 (!%p131_p10), %v925_v0  ;;  %835 = vmatprep.subr.bf16.mxu1 (!%p131_p10), %v925_v0  ;;  %v928_v5 = vld [vmem:[%s1196_s6 + $0x18] sm:$0xff] (!%p131_p10)   ;;  %v929_v6 = vld [vmem:[%s1196_s6 + $0x20] sm:$0xff] (!%p131_p10)   ;;  %v930_v7 = vld [vmem:[%s1196_s6 + $0x28] sm:$0xff] (!%p131_p10)   ;;  %s579_s28 = sadd.s32 (!%p131_p10), %s1083_s12, %s739_s26  ;;  %s582_s30 = sshll.u32 (!%p131_p10), %s1222_s25, 4  ;;  %s1237_s30 = int_to_ptr.vmem [resolvable:$true] %s582_s30 }
  0x18   : > { %s1315_s29 = smov (!%p153_p12, %s665_s29), 31  ;;  %804 = vmatpush3.bf16.xpose.msra.mxu0 %v925_v0  ;;  %843 = vmatpush3.bf16.xpose.msra.mxu1 %v925_v0  ;;  %v931_v8 = vld [vmem:[%s1196_s6 + $0x30] sm:$0xff]   ;;  %v932_v9 = vld [vmem:[%s1196_s6 + $0x38] sm:$0xff]   ;;  %s1244_s12 = scalar_lea.sflag [#allocation3], %s149_s21 }
  0x19   : > { %s666_s7 = sshll.u32 %s1315_s29, 2  ;;  %805 = vmatprep.subr.bf16.mxu0 %v926_v1  ;;  %836 = vmatprep.subr.bf16.mxu1 %v926_v1  ;;  %s720_s29 = sshll.u32 %s579_s28, 6 }
  0x1a   : > { %s1203_s18 = scalar_lea.vmem %s1296_s0, %s666_s7  ;;  %s1235_s5 = scalar_lea.hbm %s1298_s2, %s720_s29 }
  0x1b   : > { %v933_v3 = vld [vmem:[%s1203_s18] sm:$0xff]   ;;  %v935_v10 = vld [vmem:[%s1203_s18 + $0x8] sm:$0xff]   ;;  %v937_v12 = vld [vmem:[%s1203_s18 + $0x10] sm:$0xff]   ;;  %s1005_s13 = scalar_lea.vmem %s1237_s30, 1024  ;;  %s1101_s6 = smov [#allocation2]  }
  0x1c   : > { %v934_v4 = vld [vmem:[%s1203_s18 + $0x20] sm:$0xff]   ;;  %819 = vmatprep.mubr.bf16.mxu0 %v933_v3  ;;  %v936_v11 = vld [vmem:[%s1203_s18 + $0x28] sm:$0xff]   ;;  %v938_v13 = vld [vmem:[%s1203_s18 + $0x30] sm:$0xff]   ;;  %p1006_p13 = scmp.ne.s32.totalorder %s1237_s30, %s1005_s13  ;;  %s1009_s7 = sshll.u32 %s1101_s6, 4  ;;  %s1010_s7 = int_to_ptr.vmem [resolvable:$false] %s1009_s7 }
  0x1d   : > { %827 = vmatprep.mubr.bf16.mxu1 %v934_v4  ;;  %v939_v14 = vld [vmem:[%s1203_s18 + $0x18] sm:$0xff]   ;;  %s1011_s8 = scalar_lea.vmem %s1010_s7, 2048  ;;  %p1012_p2 = scmp.lt.s32.totalorder %s1237_s30, %s1010_s7 }
  0x1e   : > { %v940_v15 = vld [vmem:[%s1203_s18 + $0x38] sm:$0xff]   ;;  %p1007_p0 = pnand %p1006_p13, %p1171_p3  ;;  %p1013_p4 = scmp.lt.s32.totalorder %s1011_s8, %s1005_s13 }
  0x20   : > { %806 = vmatpush3.bf16.xpose.msra.mxu0 %v926_v1  ;;  %844 = vmatpush3.bf16.xpose.msra.mxu1 %v926_v1  ;;  %p1008_p1 = pneg %p1007_p0  ;;  %p1014_p5 = por %p1013_p4, %p1012_p2 }
  0x21   : > { %807 = vmatprep.subr.bf16.mxu0 %v927_v2  ;;  %837 = vmatprep.subr.bf16.mxu1 %v927_v2 }
  0x22   : > { %p1015_p6 = pnand %p1014_p5, %p1008_p1 }
  0x28   : > { %808 = vmatpush3.bf16.xpose.msra.mxu0 %v927_v2  ;;  %845 = vmatpush3.bf16.xpose.msra.mxu1 %v927_v2 }
  0x29   : > { %809 = vmatprep.subr.bf16.mxu0 %v928_v5  ;;  %838 = vmatprep.subr.bf16.mxu1 %v928_v5 }
  0x30   : > { %810 = vmatpush3.bf16.xpose.msra.mxu0 %v928_v5  ;;  %846 = vmatpush3.bf16.xpose.msra.mxu1 %v928_v5 }
  0x31   : > { %811 = vmatprep.subr.bf16.mxu0 %v929_v6  ;;  %839 = vmatprep.subr.bf16.mxu1 %v929_v6 }
  0x38   : > { %812 = vmatpush3.bf16.xpose.msra.mxu0 %v929_v6  ;;  %847 = vmatpush3.bf16.xpose.msra.mxu1 %v929_v6 }
  0x39   : > { %813 = vmatprep.subr.bf16.mxu0 %v930_v7  ;;  %840 = vmatprep.subr.bf16.mxu1 %v930_v7 }
  0x40   : > { %814 = vmatpush3.bf16.xpose.msra.mxu0 %v930_v7  ;;  %848 = vmatpush3.bf16.xpose.msra.mxu1 %v930_v7 }
  0x41   : > { %815 = vmatprep.subr.bf16.mxu0 %v931_v8  ;;  %841 = vmatprep.subr.bf16.mxu1 %v931_v8 }
  0x48   : > { %816 = vmatpush3.bf16.xpose.msra.mxu0 %v931_v8  ;;  %849 = vmatpush3.bf16.xpose.msra.mxu1 %v931_v8 }
  0x49   : > { %817 = vmatprep.subr.bf16.mxu0 %v932_v9  ;;  %842 = vmatprep.subr.bf16.mxu1 %v932_v9 }
  0x50   : > { %818 = vmatpush3.bf16.xpose.msra.mxu0 %v932_v9  ;;  %850 = vmatpush3.bf16.xpose.msra.mxu1 %v932_v9 }
  0x57   : > { %820 = vmatmul.mubr.bf16.vlgmr.msra.gmra.mrb[0].mxu0 %v935_v10  ;;  %828 = vmatmul.mubr.bf16.vlgmr.msra.gmra.mrb[0].mxu1 %v936_v11 }
  0x58   : > { %823 = vmatprep.mubr.bf16.mxu0 %v937_v12  ;;  %831 = vmatprep.mubr.bf16.mxu1 %v938_v13 }
  0x5f   : > { %824 = vmatmul.mubr.bf16.gmra.mrb[4].mxu0 %v939_v14  ;;  %832 = vmatmul.mubr.bf16.gmra.mrb[4].mxu1 %v940_v15 }
 0x12a   : > { %v821_v16 = vpop.f32.mrb[0].mxu0  ;;  %v829_v17 = vpop.f32.mrb[0].mxu1 }
 0x12b   : > { %v687_v18 = vmul.f32 -1.442695, %v821_v16  ;;  %v695_v19 = vmul.f32 -1.442695, %v829_v17  ;;  %v327_v20 = vpop.f32.mrb[1].mxu0  ;;  %v359_v21 = vpop.f32.mrb[1].mxu1 }
 0x12c   : > { %v685_v22 = vmul.f32 -1.442695, %v327_v20  ;;  %v693_v23 = vmul.f32 -1.442695, %v359_v21  ;;  %v822_v24 = vpop.f32.mrb[2].mxu0  ;;  %v830_v25 = vpop.f32.mrb[2].mxu1 }
 0x12d   : > { %941 = vpow2.f32 %v687_v18  ;;  %v688_v26 = vmul.f32 -1.442695, %v822_v24  ;;  %v330_v27 = vpop.f32.mrb[3].mxu0  ;;  %v362_v28 = vpop.f32.mrb[3].mxu1  ;;  %v696_v29 = vmul.f32 -1.442695, %v830_v25 }
 0x12e   : > { %943 = vpow2.f32 %v695_v19  ;;  %v686_v30 = vmul.f32 -1.442695, %v330_v27  ;;  %v694_v31 = vmul.f32 -1.442695, %v362_v28 }
 0x12f   : > { %945 = vpow2.f32 %v685_v22 }
 0x130   : > { %947 = vpow2.f32 %v693_v23 }
 0x131   : > { %949 = vpow2.f32 %v688_v26 }
 0x132   : > { %951 = vpow2.f32 %v696_v29  ;;  %v825_v32 = vpop.f32.mrb[4].mxu0  ;;  %v833_v33 = vpop.f32.mrb[4].mxu1 }
 0x133   : > { %953 = vpow2.f32 %v686_v30  ;;  %v691_v34 = vmul.f32 -1.442695, %v825_v32  ;;  %v699_v35 = vmul.f32 -1.442695, %v833_v33  ;;  %v343_v36 = vpop.f32.mrb[5].mxu0  ;;  %v375_v37 = vpop.f32.mrb[5].mxu1 }
 0x134   : > { %955 = vpow2.f32 %v694_v31  ;;  %v689_v38 = vmul.f32 -1.442695, %v343_v36  ;;  %v826_v39 = vpop.f32.mrb[6].mxu0  ;;  %v834_v40 = vpop.f32.mrb[6].mxu1  ;;  %v697_v59 = vmul.f32 -1.442695, %v375_v37 }
 0x135   : > { %957 = vpow2.f32 %v691_v34  ;;  %v692_v41 = vmul.f32 -1.442695, %v826_v39  ;;  %v346_v42 = vpop.f32.mrb[7].mxu0  ;;  %v378_v43 = vpop.f32.mrb[7].mxu1  ;;  %v700_v2 = vmul.f32 -1.442695, %v834_v40 }
 0x136   : > { %959 = vpow2.f32 %v699_v35  ;;  %v690_v5 = vmul.f32 -1.442695, %v346_v42  ;;  %v698_v7 = vmul.f32 -1.442695, %v378_v43 }
 0x137   : > { %v942_v44 = vpop.eup %941  ;;  %961 = vpow2.f32 %v689_v38 }
 0x138   : > { %v944_v45 = vpop.eup %943  ;;  %v440_v46 = vadd.f32 1.0, %v942_v44  ;;  %963 = vpow2.f32 %v692_v41 }
 0x139   : > { %v946_v47 = vpop.eup %945  ;;  %v448_v48 = vadd.f32 1.0, %v944_v45 }
 0x13a   : > { %v948_v49 = vpop.eup %947  ;;  %965 = vrcp.f32 %v440_v46  ;;  %v438_v50 = vadd.f32 1.0, %v946_v47 }
 0x13b   : > { %v950_v51 = vpop.eup %949  ;;  %967 = vrcp.f32 %v448_v48  ;;  %v446_v52 = vadd.f32 1.0, %v948_v49 }
 0x13c   : > { %v952_v53 = vpop.eup %951  ;;  %969 = vrcp.f32 %v438_v50  ;;  %v441_v54 = vadd.f32 1.0, %v950_v51 }
 0x13d   : > { %v954_v55 = vpop.eup %953  ;;  %971 = vrcp.f32 %v446_v52  ;;  %v449_v56 = vadd.f32 1.0, %v952_v53 }
 0x13e   : > { %v956_v57 = vpop.eup %955  ;;  %973 = vrcp.f32 %v441_v54  ;;  %v439_v58 = vadd.f32 1.0, %v954_v55 }
 0x13f   : > { %v958_v60 = vpop.eup %957  ;;  %975 = vrcp.f32 %v449_v56  ;;  %v447_v61 = vadd.f32 1.0, %v956_v57 }
 0x140   : > { %977 = vrcp.f32 %v439_v58  ;;  %v960_v62 = vpop.eup %959  ;;  %v444_v63 = vadd.f32 1.0, %v958_v60 }
 0x141   : > { %979 = vrcp.f32 %v447_v61  ;;  %v962_v0 = vpop.eup %961  ;;  %v452_v19 = vadd.f32 1.0, %v960_v62 }
 0x142   : > { %981 = vpow2.f32 %v697_v59  ;;  %v964_v1 = vpop.eup %963  ;;  %v442_v20 = vadd.f32 1.0, %v962_v0 }
 0x143   : > { %v445_v4 = vadd.f32 1.0, %v964_v1  ;;  %983 = vrcp.f32 %v444_v63 }
 0x144   : > { %v966_v3 = vpop.eup %965 }
 0x145   : > { %v968_v6 = vpop.eup %967  ;;  %985 = vrcp.f32 %v445_v4 }
 0x146   : > { %v970_v8 = vpop.eup %969  ;;  %987 = vpow2.f32 %v700_v2 }
 0x147   : > { %v972_v9 = vpop.eup %971  ;;  %989 = vpow2.f32 %v690_v5 }
 0x148   : > { %v974_v10 = vpop.eup %973  ;;  %991 = vpow2.f32 %v698_v7 }
 0x149   : > { %v976_v11 = vpop.eup %975  ;;  %v748_v12 = vpack.c.bf16 %v974_v10, %v966_v3  ;;  %993 = vrcp.f32 %v452_v19 }
 0x14a   : > { %v978_v13 = vpop.eup %977  ;;  %v768_v14 = vpack.c.bf16 %v976_v11, %v968_v6  ;;  %995 = vrcp.f32 %v442_v20 }
 0x14b   : > { %v980_v15 = vpop.eup %979  ;;  %780 = vst [vmem:[%s1222_s25 + $0x8] sm:$0xff] %v748_v12   ;;  %v743_v16 = vpack.c.bf16 %v978_v13, %v970_v8 }
 0x14c   : > { %v982_v17 = vpop.eup %981  ;;  %784 = vst [vmem:[%s1222_s25 + $0x28] sm:$0xff] %v768_v14   ;;  %v763_v18 = vpack.c.bf16 %v980_v15, %v972_v9 }
 0x14d   : > { %744 = vst [vmem:[%s1222_s25] sm:$0xff] %v743_v16   ;;  %v984_v21 = vpop.eup %983  ;;  %v450_v22 = vadd.f32 1.0, %v982_v17 }
 0x14e   : > { %783 = vst [vmem:[%s1222_s25 + $0x20] sm:$0xff] %v763_v18  }
 0x14f   : > { %v986_v23 = vpop.eup %985  ;;  %997 = vrcp.f32 %v450_v22 }
 0x150   : > { %v988_v24 = vpop.eup %987  ;;  %v758_v25 = vpack.c.bf16 %v986_v23, %v984_v21 }
 0x151   : > { %v990_v26 = vpop.eup %989  ;;  %v453_v27 = vadd.f32 1.0, %v988_v24 }
 0x152   : > { %v992_v28 = vpop.eup %991  ;;  %782 = vst [vmem:[%s1222_s25 + $0x18] sm:$0xff] %v758_v25   ;;  %v443_v29 = vadd.f32 1.0, %v990_v26 }
 0x153   : > { %999 = vrcp.f32 %v453_v27  ;;  %v451_v30 = vadd.f32 1.0, %v992_v28  ;;  %v994_v31 = vpop.eup %993 }
 0x154   : > { %1001 = vrcp.f32 %v443_v29  ;;  %v996_v32 = vpop.eup %995 }
 0x155   : > { %1003 = vrcp.f32 %v451_v30 }
 0x159   : > { %v998_v33 = vpop.eup %997 }
 0x15d   : > { %v1000_v34 = vpop.eup %999 }
 0x15e   : > { %v1002_v35 = vpop.eup %1001  ;;  %v778_v36 = vpack.c.bf16 %v1000_v34, %v994_v31 }
 0x15f   : > { %v1004_v37 = vpop.eup %1003  ;;  %v753_v38 = vpack.c.bf16 %v1002_v35, %v996_v32 }
 0x160   : > { %786 = vst [vmem:[%s1222_s25 + $0x38] sm:$0xff] %v778_v36   ;;  %v773_v39 = vpack.c.bf16 %v1004_v37, %v998_v33 }
 0x161   : > { %781 = vst [vmem:[%s1222_s25 + $0x10] sm:$0xff] %v753_v38  }
 0x162   : > { %785 = vst [vmem:[%s1222_s25 + $0x30] sm:$0xff] %v773_v39  }
 0x163   : > { %1018 = shalt.err (!%p1015_p6)
}
 0x164   : > { %s1019_s17 = scalar_lea.hbm %s1235_s5, 1024  ;;  %s1023_s24 = scalar_lea.hbm %s1298_s2, 4096 }
 0x165   : > { %p1020_p7 = scmp.ne.s32.totalorder %s1235_s5, %s1019_s17  ;;  %p1024_p11 = scmp.lt.u32.totalorder %s1235_s5, %s1298_s2 }
 0x166   : > { %p1025_p12 = scmp.lt.u32.totalorder %s1023_s24, %s1019_s17  ;;  %p1027_p0 = scmp.lt.u32.totalorder %s1019_s17, %s1235_s5 }
 0x167   : > { %p1021_p9 = pnand %p1020_p7, %p1171_p3 }
 0x168   : > { %p1026_p13 = por %p1025_p12, %p1024_p11 }
 0x169   : > { %p1022_p10 = pneg %p1021_p9 }
 0x16a   : > { %p1028_p1 = por %p1027_p0, %p1026_p13 }
 0x16c   : > { %p1029_p2 = pnand %p1028_p1, %p1022_p10 }
 0x16e   : > { %1032 = shalt.err (!%p1029_p2)
}
 0x16f   : > { %s1102_s28 = smov 64   ;;  %s1103_s29 = smov 128  }
 0x170   : > { %s1104_s3 = smov 4  }
 0x171   : > { %851 = dma.vmem_to_hbm [thread:$0]  (%p1171_p3), %s1237_s30, 1024, %s1235_s5, %s1244_s12, %s1102_s28, %s1103_s29, %s1104_s3  }
 0x172 PF: > { %p857_p4 = scmp.ge.s32.totalorder %s1099_s16, 2  ;;  %s597_s4 = sand.u32 1, %s1071_s9  }
 0x173   : > { %s598_s13 = scalar_lea.sflag [#allocation3], %s597_s4 }
 0x174   : > { %p854_p5 = pnand %p857_p4, %p1180_p8 }
 0x176   : > { %1066 = dma.done.wait (!%p854_p5), %s598_s13, 1024  }
 0x177   : > { %1068 = vsyncadd (!%p854_p5), %s598_s13, 4294966272  ;;  %s15_s16 = sadd.s32 1, %s1099_s16   ;;  %s1301_s9 = smov %s1075_s10 }
 0x178   : > { %p12_p6 = scmp.ge.s32.totalorder %s15_s16, 6   ;;  %s1302_s10 = smov %s1079_s11 }
 0x179   : > { %s1303_s11 = smov %s1189_s27  ;;  %s1304_s12 = smov %s1091_s14 }
 0x17a   : > { %s1305_s13 = smov %s1095_s15  ;;  %s1306_s14 = smov %s1309_s19 }
 0x17b   : > { %s1307_s15 = smov %s1313_s20  ;;  %14 = sbr.rel (!%p12_p6) target bundleno = 5 (0x5), region = 64 }
 0x182   :  { %603 = vsyncpa [#allocation3], 1 }
 0x183   :  { %605 = vsyncpa [#allocation3 + $0x1], 1 }

// kernel: gcn_forward.5
= control target key start
LH: loop header
LB: loop body
LE: loop exit
PB: predicated region body
PF: predicated region fallthrough
CT: control target
= control target key end

     0   :  { %s1554_s18 = smov 0   ;;  %s1556_s19 = smov 0   ;;  %s1736_s0 = inlined_call_operand.vmem [shape: bf16[256,256], index: 0, kind: input, shape index: {}]   ;;  %s1737_s1 = inlined_call_operand.vmem [shape: bf16[256,128], index: 1, kind: input, shape index: {}]   ;;  %s1738_s2 = inlined_call_operand.vmem [shape: f32[1,128], index: 2, kind: input, shape index: {}]   ;;  %s1739_s3 = inlined_call_operand.vmem [shape: bf16[256,128], index: 3, kind: input, shape index: {}]   ;;  %s1740_s4 = inlined_call_operand.vmem [shape: bf16[128,128], index: 4, kind: input, shape index: {}]   ;;  %s1741_s5 = inlined_call_operand.vmem [shape: bf16[256,128], index: 5, kind: output, shape index: {}]  }
   0x1   :  { %s1558_s20 = smov 0   ;;  %s1560_s21 = smov 0  }
   0x2   :  { %s1562_s22 = smov 0   ;;  %s1564_s23 = smov 0  }
   0x3   :  { %s1566_s24 = smov 0  }
   0x4 LB: > { %s24_s25 = sadd.s32 1, %s1514_s22  ;;  %s27_s26 = sadd.s32 1, %s1518_s23  ;;  %s1522_s24 = sphi %s1566_s24, %s15_s24   ;;  %s1518_s23 = sphi %s1564_s23, %s1747_s23   ;;  %s1514_s22 = sphi %s1562_s22, %s1746_s22   ;;  %s1510_s21 = sphi %s1560_s21, %s1745_s21   ;;  %s1506_s20 = sphi %s1558_s20, %s1744_s20   ;;  %s1502_s19 = sphi %s1556_s19, %s1743_s19   ;;  %s1498_s18 = sphi %s1554_s18, %s1742_s18  }
   0x5   : > { %p25_p0 = scmp.ge.s32.totalorder %s24_s25, 2  ;;  %p43_p1 = scmp.ne.s32.totalorder %s1502_s19, %s1498_s18 }
   0x6   : > { %p44_p2 = scmp.eq.s32.totalorder %s1522_s24, 0  ;;  %s36_s30 = sadd.s32 1, %s1502_s19 }
   0x7   : > { %s1749_s25 = smov (%p25_p0, %s24_s25), 0  ;;  %s1751_s26 = smov (!%p25_p0, %s27_s26), %s1518_s23 }
   0x8   : > { %p45_p3 = por %p44_p2, %p43_p1  ;;  %p29_p4 = scmp.ge.s32.totalorder %s1751_s26, 2 }
   0x9   : > { %s32_s27 = ssub.s32 %s1514_s22, %s1749_s25  ;;  %p1099_p6 = scmp.ge.s32.totalorder %s1522_s24, 4 }
   0xa   : > { %s1753_s26 = smov (%p29_p4, %s1751_s26), 0 }
   0xb   : > { %s31_s28 = ssub.s32 %s1518_s23, %s1753_s26  ;;  %193 = sbr.rel (%p1099_p6) target bundleno = 34 (0x22), region = 28 }
   0xc   : > { %s33_s29 = sor.u32 %s32_s27, %s31_s28 }
   0xd   : > { %p34_p5 = scmp.eq.s32.totalorder %s33_s29, 0 }
   0xf   : > { %s1605_s6 = scalar_select %p34_p5, %s1502_s19, %s36_s30  }
  0x12   : > { %196 = sbr.rel (!%p45_p3) target bundleno = 34 (0x22), region = 32  ;;  %s198_s7 = sand.u32 (%p45_p3), 1, %s1502_s19  }
  0x13   : > { %s1157_s8 = sshll.u32 (%p45_p3), %s1518_s23, 5  ;;  %s1100_s9 = sshll.u32 (%p45_p3), %s198_s7, 6 }
  0x14   : > { %s203_s10 = sadd.s32 (%p45_p3), %s1514_s22, %s1157_s8  ;;  %s200_s15 = scalar_lea.vmem (%p45_p3), [#allocation3], %s1100_s9 }
  0x15   : > { %s1103_s11 = sshll.u32 (%p45_p3), %s203_s10, 2 }
  0x16   : > { %s1614_s14 = scalar_lea.vmem (%p45_p3), %s1736_s0, %s1103_s11 }
  0x17   : > { %v221_v0 = vld [vmem:[%s1614_s14] sm:$0xf] (%p45_p3)  ;;  %v223_v1 = vld [vmem:[%s1614_s14 + $0x8] sm:$0xf] (%p45_p3)  ;;  %v225_v2 = vld [vmem:[%s1614_s14 + $0x10] sm:$0xf] (%p45_p3) }
  0x18   : > { %222 = vst [vmem:[%s200_s15] sm:$0xf] (%p45_p3), %v221_v0  ;;  %224 = vst [vmem:[%s200_s15 + $0x4] sm:$0xf] (%p45_p3), %v223_v1  ;;  %v227_v3 = vld [vmem:[%s1614_s14 + $0x18] sm:$0xf] (%p45_p3) }
  0x19   : > { %226 = vst [vmem:[%s200_s15 + $0x8] sm:$0xf] %v225_v2  ;;  %v229_v4 = vld [vmem:[%s1614_s14 + $0x20] sm:$0xf]  ;;  %v231_v5 = vld [vmem:[%s1614_s14 + $0x28] sm:$0xf] }
  0x1a   : > { %228 = vst [vmem:[%s200_s15 + $0xc] sm:$0xf] %v227_v3  ;;  %230 = vst [vmem:[%s200_s15 + $0x10] sm:$0xf] %v229_v4  ;;  %v233_v6 = vld [vmem:[%s1614_s14 + $0x30] sm:$0xf] }
  0x1b   : > { %232 = vst [vmem:[%s200_s15 + $0x14] sm:$0xf] %v231_v5  ;;  %v235_v7 = vld [vmem:[%s1614_s14 + $0x38] sm:$0xf]  ;;  %v237_v8 = vld [vmem:[%s1614_s14 + $0x40] sm:$0xf] }
  0x1c   : > { %234 = vst [vmem:[%s200_s15 + $0x18] sm:$0xf] %v233_v6  ;;  %236 = vst [vmem:[%s200_s15 + $0x1c] sm:$0xf] %v235_v7  ;;  %v239_v9 = vld [vmem:[%s1614_s14 + $0x48] sm:$0xf] }
  0x1d   : > { %238 = vst [vmem:[%s200_s15 + $0x20] sm:$0xf] %v237_v8  ;;  %v241_v10 = vld [vmem:[%s1614_s14 + $0x50] sm:$0xf]  ;;  %v243_v11 = vld [vmem:[%s1614_s14 + $0x58] sm:$0xf] }
  0x1e   : > { %240 = vst [vmem:[%s200_s15 + $0x24] sm:$0xf] %v239_v9  ;;  %242 = vst [vmem:[%s200_s15 + $0x28] sm:$0xf] %v241_v10  ;;  %v245_v12 = vld [vmem:[%s1614_s14 + $0x60] sm:$0xf] }
  0x1f   : > { %244 = vst [vmem:[%s200_s15 + $0x2c] sm:$0xf] %v243_v11  ;;  %v247_v13 = vld [vmem:[%s1614_s14 + $0x68] sm:$0xf]  ;;  %v249_v14 = vld [vmem:[%s1614_s14 + $0x70] sm:$0xf] }
  0x20   : > { %246 = vst [vmem:[%s200_s15 + $0x30] sm:$0xf] %v245_v12  ;;  %248 = vst [vmem:[%s200_s15 + $0x34] sm:$0xf] %v247_v13  ;;  %v251_v15 = vld [vmem:[%s1614_s14 + $0x78] sm:$0xf] }
  0x21   : > { %250 = vst [vmem:[%s200_s15 + $0x38] sm:$0xf] %v249_v14  ;;  %252 = vst [vmem:[%s200_s15 + $0x3c] sm:$0xf] %v251_v15 }
  0x22 PF: > { %p1104_p7 = scmp.ge.s32.totalorder %s1522_s24, 1  ;;  %p315_p8 = scmp.lt.s32.totalorder %s1522_s24, 5 }
  0x24   : > { %p316_p9 = pnand %p1104_p7, %p315_p8 }
  0x25   : > { %s322_s16 = sand.u32 (!%p316_p9), 1, %s1498_s18   ;;  %s1106_s17 = sshll.u32 (!%p316_p9), %s1510_s21, 4 }
  0x26   : > { %319 = sbr.rel (%p316_p9) target bundleno = 551 (0x227), region = 77  ;;  %s1105_s27 = sshll.u32 (!%p316_p9), %s322_s16, 6 }
  0x27   : > { %p356_p10 = scmp.lt.s32.totalorder (!%p316_p9), %s1106_s17, 31  ;;  %s1646_s11 = scalar_lea.vmem (!%p316_p9), [#allocation3], %s1105_s27 }
  0x28   : > { %p1110_p11 = scmp.ne.s32.totalorder (!%p316_p9), %s1506_s20, 0 }
  0x2d   : > { %s1755_s17 = smov (!%p356_p10, %s1106_s17), 31  ;;  %371 = sbr.rel (%p1110_p11) target bundleno = 55 (0x37), region = 85 }
  0x2e   : > { %s1107_s28 = sshll.u32 %s1755_s17, 2  ;;  %v1111_v16 = vld [vmem:[%s1738_s2] ss:$0 sm:$0xff] (!%p1110_p11) }
  0x2f   : > { %s1639_s7 = scalar_lea.vmem %s1739_s3, %s1107_s28  ;;  %s1644_s10 = scalar_lea.vmem %s1741_s5, %s1107_s28  ;;  %379 = vst [vmem:[#allocation2] sm:$0xff] (!%p1110_p11), %v1111_v16  ;;  %380 = vst [vmem:[#allocation2 + $0x8] sm:$0xff] (!%p1110_p11), %v1111_v16 }
  0x30   : > { %381 = vst [vmem:[#allocation2 + $0x10] sm:$0xff] (!%p1110_p11), %v1111_v16  ;;  %382 = vst [vmem:[#allocation2 + $0x18] sm:$0xff] (!%p1110_p11), %v1111_v16 }
  0x31   : > { %383 = vst [vmem:[#allocation2 + $0x20] sm:$0xff] (!%p1110_p11), %v1111_v16  ;;  %384 = vst [vmem:[#allocation2 + $0x28] sm:$0xff] (!%p1110_p11), %v1111_v16 }
  0x32   : > { %385 = vst [vmem:[#allocation2 + $0x30] sm:$0xff] (!%p1110_p11), %v1111_v16  ;;  %386 = vst [vmem:[#allocation2 + $0x38] sm:$0xff] (!%p1110_p11), %v1111_v16 }
  0x33   : > { %387 = vst [vmem:[#allocation2 + $0x40] sm:$0xff] (!%p1110_p11), %v1111_v16  ;;  %388 = vst [vmem:[#allocation2 + $0x48] sm:$0xff] (!%p1110_p11), %v1111_v16 }
  0x34   : > { %389 = vst [vmem:[#allocation2 + $0x50] sm:$0xff] %v1111_v16  ;;  %390 = vst [vmem:[#allocation2 + $0x58] sm:$0xff] %v1111_v16 }
  0x35   : > { %391 = vst [vmem:[#allocation2 + $0x60] sm:$0xff] %v1111_v16  ;;  %392 = vst [vmem:[#allocation2 + $0x68] sm:$0xff] %v1111_v16 }
  0x36   : > { %393 = vst [vmem:[#allocation2 + $0x70] sm:$0xff] %v1111_v16  ;;  %394 = vst [vmem:[#allocation2 + $0x78] sm:$0xff] %v1111_v16 }
  0x37 PF: > { %s1112_s12 = sshll.u32 %s1506_s20, 7  ;;  %v1452_v17 = vld [vmem:[%s1646_s11] sm:$0xff]   ;;  %v1454_v27 = vld [vmem:[%s1646_s11 + $0x8] sm:$0xff]   ;;  %v1456_v29 = vld [vmem:[%s1646_s11 + $0x10] sm:$0xff]   ;;  %p1130_p12 = scmp.ne.s32.totalorder %s1506_s20, 1 }
  0x38   : > { %s428_s13 = sshra.s32 %s1112_s12, 3  ;;  %v1453_v18 = vld [vmem:[%s1646_s11 + $0x20] sm:$0xff]   ;;  %1308 = vmatprep.mubr.bf16.mxu0 %v1452_v17  ;;  %v1455_v28 = vld [vmem:[%s1646_s11 + $0x28] sm:$0xff]   ;;  %v1457_v30 = vld [vmem:[%s1646_s11 + $0x30] sm:$0xff]  }
  0x39   : > { %s1113_s14 = sshll.u32 %s428_s13, 2  ;;  %1316 = vmatprep.mubr.bf16.mxu1 %v1453_v18  ;;  %v1458_v31 = vld [vmem:[%s1646_s11 + $0x18] sm:$0xff]   ;;  %v396_v35 = vld [vmem:[#allocation2] sm:$0xff]  ;;  %v397_v45 = vld [vmem:[#allocation2 + $0x8] sm:$0xff] }
  0x3a   : > { %s1658_s17 = scalar_lea.vmem %s1737_s1, %s1113_s14  ;;  %v1459_v32 = vld [vmem:[%s1646_s11 + $0x38] sm:$0xff]   ;;  %v398_v33 = vld [vmem:[#allocation2 + $0x10] sm:$0xff]  ;;  %v1460_v17 = vld [vmem:[%s1740_s4] sm:$0xff] (!%p1130_p12)  }
  0x3b   : > { %v1444_v19 = vld [vmem:[%s1658_s17] sm:$0xff]   ;;  %v1445_v20 = vld [vmem:[%s1658_s17 + $0x8] sm:$0xff]   ;;  %v1446_v21 = vld [vmem:[%s1658_s17 + $0x10] sm:$0xff]  }
  0x3c   : > { %1292 = vmatprep.subr.bf16.mxu0 %v1444_v19  ;;  %1356 = vmatprep.subr.bf16.mxu1 %v1444_v19  ;;  %v1447_v22 = vld [vmem:[%s1658_s17 + $0x18] sm:$0xff]   ;;  %v1448_v23 = vld [vmem:[%s1658_s17 + $0x20] sm:$0xff]   ;;  %v1449_v24 = vld [vmem:[%s1658_s17 + $0x28] sm:$0xff]  }
  0x3d   : > { %1293 = vmatpush3.bf16.msra.mxu0 %v1444_v19  ;;  %1364 = vmatpush3.bf16.msra.mxu1 %v1444_v19  ;;  %v1450_v25 = vld [vmem:[%s1658_s17 + $0x30] sm:$0xff]   ;;  %v1451_v26 = vld [vmem:[%s1658_s17 + $0x38] sm:$0xff]   ;;  %v404_v36 = vld [vmem:[#allocation2 + $0x40] sm:$0xff] }
  0x3e   : > { %1294 = vmatprep.subr.bf16.mxu0 %v1445_v20  ;;  %1357 = vmatprep.subr.bf16.mxu1 %v1445_v20  ;;  %v406_v34 = vld [vmem:[#allocation2 + $0x50] sm:$0xff]  ;;  %v399_v39 = vld [vmem:[#allocation2 + $0x18] sm:$0xff]  ;;  %v405_v46 = vld [vmem:[#allocation2 + $0x48] sm:$0xff] }
  0x3f   : > { %v407_v40 = vld [vmem:[#allocation2 + $0x58] sm:$0xff]  ;;  %v402_v57 = vld [vmem:[#allocation2 + $0x30] sm:$0xff]  ;;  %v400_v59 = vld [vmem:[#allocation2 + $0x20] sm:$0xff] }
  0x40   : > { %v410_v58 = vld [vmem:[#allocation2 + $0x70] sm:$0xff]  ;;  %v408_v60 = vld [vmem:[#allocation2 + $0x60] sm:$0xff]  ;;  %v403_v63 = vld [vmem:[#allocation2 + $0x38] sm:$0xff] }
  0x41   : > { %1295 = vmatpush3.bf16.msra.mxu0 %v1445_v20  ;;  %1365 = vmatpush3.bf16.msra.mxu1 %v1445_v20  ;;  %v411_v0 = vld [vmem:[#allocation2 + $0x78] sm:$0xff]  ;;  %v401_v5 = vld [vmem:[#allocation2 + $0x28] sm:$0xff]  ;;  %v1462_v19 = vld [vmem:[%s1740_s4 + $0x10] sm:$0xff] (!%p1130_p12)  }
  0x42   : > { %1296 = vmatprep.subr.bf16.mxu0 %v1446_v21  ;;  %1358 = vmatprep.subr.bf16.mxu1 %v1446_v21  ;;  %v409_v6 = vld [vmem:[#allocation2 + $0x68] sm:$0xff]  ;;  %v1463_v20 = vld [vmem:[%s1740_s4 + $0x18] sm:$0xff] (!%p1130_p12)  }
  0x43   : > { %v1461_v18 = vld [vmem:[%s1740_s4 + $0x8] sm:$0xff] (!%p1130_p12)  }
  0x45   : > { %1297 = vmatpush3.bf16.msra.mxu0 %v1446_v21  ;;  %1366 = vmatpush3.bf16.msra.mxu1 %v1446_v21 }
  0x46   : > { %1298 = vmatprep.subr.bf16.mxu0 %v1447_v22  ;;  %1359 = vmatprep.subr.bf16.mxu1 %v1447_v22 }
  0x49   : > { %1299 = vmatpush3.bf16.msra.mxu0 %v1447_v22  ;;  %1367 = vmatpush3.bf16.msra.mxu1 %v1447_v22 }
  0x4a   : > { %1300 = vmatprep.subr.bf16.mxu0 %v1448_v23  ;;  %1360 = vmatprep.subr.bf16.mxu1 %v1448_v23 }
  0x4d   : > { %1301 = vmatpush3.bf16.msra.mxu0 %v1448_v23  ;;  %1368 = vmatpush3.bf16.msra.mxu1 %v1448_v23  ;;  %v1175_v23 = vld [vmem:[%s1639_s7] sm:$0xff] (!%p1130_p12)  }
  0x4e   : > { %1302 = vmatprep.subr.bf16.mxu0 %v1449_v24  ;;  %1361 = vmatprep.subr.bf16.mxu1 %v1449_v24 }
  0x51   : > { %1303 = vmatpush3.bf16.msra.mxu0 %v1449_v24  ;;  %1369 = vmatpush3.bf16.msra.mxu1 %v1449_v24 }
  0x52   : > { %1304 = vmatprep.subr.bf16.mxu0 %v1450_v25  ;;  %1362 = vmatprep.subr.bf16.mxu1 %v1450_v25 }
  0x55   : > { %1305 = vmatpush3.bf16.msra.mxu0 %v1450_v25  ;;  %1370 = vmatpush3.bf16.msra.mxu1 %v1450_v25 }
  0x56   : > { %1306 = vmatprep.subr.bf16.mxu0 %v1451_v26  ;;  %1363 = vmatprep.subr.bf16.mxu1 %v1451_v26 }
  0x59   : > { %1307 = vmatpush3.bf16.msra.mxu0 %v1451_v26  ;;  %1371 = vmatpush3.bf16.msra.mxu1 %v1451_v26  ;;  %v1176_v26 = vunpack.c.l.bf16 (!%p1130_p12), %v1175_v23 }
  0x5a   : > { %1324 = vmatprep.subr.bf16.mxu0 (!%p1130_p12), %v1460_v17  ;;  %1372 = vmatprep.subr.bf16.mxu1 (!%p1130_p12), %v1460_v17 }
  0x5c   : > { %1309 = vmatmul.mubr.bf16.vlgmr.msra.gmra.mrb[0].mxu0 %v1454_v27  ;;  %1317 = vmatmul.mubr.bf16.vlgmr.msra.gmra.mrb[0].mxu1 %v1455_v28  ;;  %v1177_v27 = vunpack.c.h.bf16 (!%p1130_p12), %v1175_v23 }
  0x5d   : > { %1312 = vmatprep.mubr.bf16.mxu0 %v1456_v29  ;;  %1320 = vmatprep.mubr.bf16.mxu1 %v1457_v30  ;;  %v1249_v30 = vld [vmem:[%s1639_s7 + $0x20] sm:$0xff] (!%p1130_p12)  }
  0x5e   : > { %1325 = vmatpush3.bf16.msra.mxu0 (!%p1130_p12), %v1460_v17  ;;  %1380 = vmatpush3.bf16.msra.mxu1 (!%p1130_p12), %v1460_v17 }
  0x5f   : > { %1326 = vmatprep.subr.bf16.mxu0 (!%p1130_p12), %v1461_v18  ;;  %1373 = vmatprep.subr.bf16.mxu1 (!%p1130_p12), %v1461_v18 }
  0x62   : > { %1327 = vmatpush3.bf16.msra.mxu0 (!%p1130_p12), %v1461_v18  ;;  %1381 = vmatpush3.bf16.msra.mxu1 (!%p1130_p12), %v1461_v18 }
  0x63   : > { %1328 = vmatprep.subr.bf16.mxu0 (!%p1130_p12), %v1462_v19  ;;  %1374 = vmatprep.subr.bf16.mxu1 (!%p1130_p12), %v1462_v19 }
  0x64   : > { %1313 = vmatmul.mubr.bf16.gmra.mrb[4].mxu0 %v1458_v31  ;;  %1321 = vmatmul.mubr.bf16.gmra.mrb[4].mxu1 %v1459_v32 }
  0x66   : > { %1329 = vmatpush3.bf16.msra.mxu0 (!%p1130_p12), %v1462_v19  ;;  %1382 = vmatpush3.bf16.msra.mxu1 (!%p1130_p12), %v1462_v19 }
  0x67   : > { %1330 = vmatprep.subr.bf16.mxu0 (!%p1130_p12), %v1463_v20  ;;  %1375 = vmatprep.subr.bf16.mxu1 (!%p1130_p12), %v1463_v20 }
  0x6a   : > { %1331 = vmatpush3.bf16.msra.mxu0 (!%p1130_p12), %v1463_v20  ;;  %1383 = vmatpush3.bf16.msra.mxu1 (!%p1130_p12), %v1463_v20 }
 0x12f   : > { %v1310_v37 = vpop.f32.mrb[0].mxu0  ;;  %v1318_v38 = vpop.f32.mrb[0].mxu1 }
 0x130   : > { %v643_v41 = vadd.f32 %v1310_v37, %v398_v33  ;;  %v651_v42 = vadd.f32 %v1318_v38, %v406_v34  ;;  %v578_v43 = vpop.f32.mrb[1].mxu0  ;;  %v610_v44 = vpop.f32.mrb[1].mxu1  ;;  %v1192_v33 = vunpack.c.l.bf16 (!%p1130_p12), %v1249_v30  ;;  %v1193_v34 = vunpack.c.h.bf16 (!%p1130_p12), %v1249_v30  ;;  %v1464_v37 = vld [vmem:[%s1740_s4 + $0x20] sm:$0xff] (!%p1130_p12)  }
 0x131   : > { %v641_v47 = vadd.f32 %v578_v43, %v396_v35  ;;  %v649_v48 = vadd.f32 %v610_v44, %v404_v36  ;;  %v1311_v49 = vpop.f32.mrb[2].mxu0  ;;  %v1319_v50 = vpop.f32.mrb[2].mxu1  ;;  %v1246_v43 = vld [vmem:[%s1639_s7 + $0x8] sm:$0xff] (!%p1130_p12)   ;;  %1332 = vmatprep.subr.bf16.mxu0 (!%p1130_p12), %v1464_v37  ;;  %1376 = vmatprep.subr.bf16.mxu1 (!%p1130_p12), %v1464_v37 }
 0x132   : > { %659 = vst [vmem:[#allocation2 + $0x10] sm:$0xff] %v643_v41  ;;  %667 = vst [vmem:[#allocation2 + $0x50] sm:$0xff] %v651_v42  ;;  %v644_v51 = vadd.f32 %v1311_v49, %v399_v39  ;;  %v652_v52 = vadd.f32 %v1319_v50, %v407_v40  ;;  %v581_v53 = vpop.f32.mrb[3].mxu0  ;;  %v613_v54 = vpop.f32.mrb[3].mxu1  ;;  %v1465_v44 = vld [vmem:[%s1740_s4 + $0x28] sm:$0xff] (!%p1130_p12)   ;;  %1333 = vmatpush3.bf16.msra.mxu0 (!%p1130_p12), %v1464_v37  ;;  %1384 = vmatpush3.bf16.msra.mxu1 (!%p1130_p12), %v1464_v37 }
 0x133   : > { %657 = vst [vmem:[#allocation2] sm:$0xff] %v641_v47  ;;  %665 = vst [vmem:[#allocation2 + $0x40] sm:$0xff] %v649_v48  ;;  %v642_v55 = vadd.f32 %v581_v53, %v397_v45  ;;  %v650_v56 = vadd.f32 %v613_v54, %v405_v46  ;;  %v1180_v47 = vunpack.c.l.bf16 (!%p1130_p12), %v1246_v43  ;;  %v1250_v50 = vld [vmem:[%s1639_s7 + $0x28] sm:$0xff] (!%p1130_p12)   ;;  %v1181_v53 = vunpack.c.h.bf16 (!%p1130_p12), %v1246_v43  ;;  %1334 = vmatprep.subr.bf16.mxu0 (!%p1130_p12), %v1465_v44 }
 0x134   : > { %660 = vst [vmem:[#allocation2 + $0x18] sm:$0xff] %v644_v51  ;;  %668 = vst [vmem:[#allocation2 + $0x58] sm:$0xff] %v652_v52  ;;  %v1466_v51 = vld [vmem:[%s1740_s4 + $0x30] sm:$0xff] (!%p1130_p12)   ;;  %1377 = vmatprep.subr.bf16.mxu1 (!%p1130_p12), %v1465_v44 }
 0x135   : > { %658 = vst [vmem:[#allocation2 + $0x8] sm:$0xff] %v642_v55  ;;  %666 = vst [vmem:[#allocation2 + $0x48] sm:$0xff] %v650_v56  ;;  %v1247_v56 = vld [vmem:[%s1639_s7 + $0x10] sm:$0xff] (!%p1130_p12)  }
 0x136   : > { %1335 = vmatpush3.bf16.msra.mxu0 (!%p1130_p12), %v1465_v44  ;;  %1385 = vmatpush3.bf16.msra.mxu1 (!%p1130_p12), %v1465_v44 }
 0x137   : > { %v1314_v61 = vpop.f32.mrb[4].mxu0  ;;  %v1322_v62 = vpop.f32.mrb[4].mxu1  ;;  %676 = sbr.rel (%p1130_p12) target bundleno = 551 (0x227), region = 89  ;;  %1336 = vmatprep.subr.bf16.mxu0 (!%p1130_p12), %v1466_v51  ;;  %1378 = vmatprep.subr.bf16.mxu1 (!%p1130_p12), %v1466_v51 }
 0x138   : > { %v647_v1 = vadd.f32 %v1314_v61, %v402_v57  ;;  %v655_v2 = vadd.f32 %v1322_v62, %v410_v58  ;;  %v594_v3 = vpop.f32.mrb[5].mxu0  ;;  %v626_v4 = vpop.f32.mrb[5].mxu1 }
 0x139   : > { %v645_v7 = vadd.f32 %v594_v3, %v400_v59  ;;  %v653_v8 = vadd.f32 %v626_v4, %v408_v60  ;;  %v1315_v9 = vpop.f32.mrb[6].mxu0  ;;  %v1323_v10 = vpop.f32.mrb[6].mxu1  ;;  %v679_v42 = vld [vmem:[#allocation2 + $0x10] sm:$0xff] (!%p1130_p12)  ;;  %v1196_v59 = vunpack.c.l.bf16 (!%p1130_p12), %v1250_v50  ;;  %v1197_v60 = vunpack.c.h.bf16 (!%p1130_p12), %v1250_v50 }
 0x13a   : > { %663 = vst [vmem:[#allocation2 + $0x30] sm:$0xff] %v647_v1  ;;  %671 = vst [vmem:[#allocation2 + $0x70] sm:$0xff] %v655_v2  ;;  %v648_v11 = vadd.f32 %v1315_v9, %v403_v63  ;;  %v656_v12 = vadd.f32 %v1323_v10, %v411_v0  ;;  %v597_v13 = vpop.f32.mrb[7].mxu0  ;;  %v629_v14 = vpop.f32.mrb[7].mxu1  ;;  %v677_v21 = vld [vmem:[#allocation2] sm:$0xff] (!%p1130_p12)  ;;  %v695_v46 = vmax.f32 (!%p1130_p12), %v679_v42, 0.0  ;;  %v1184_v3 = vunpack.c.l.bf16 (!%p1130_p12), %v1247_v56  ;;  %1337 = vmatpush3.bf16.msra.mxu0 (!%p1130_p12), %v1466_v51 }
 0x13b   : > { %661 = vst [vmem:[#allocation2 + $0x20] sm:$0xff] %v645_v7  ;;  %669 = vst [vmem:[#allocation2 + $0x60] sm:$0xff] %v653_v8  ;;  %v646_v15 = vadd.f32 %v597_v13, %v401_v5  ;;  %v654_v16 = vadd.f32 %v629_v14, %v409_v6  ;;  %v693_v24 = vmax.f32 (!%p1130_p12), %v677_v21, 0.0  ;;  %v685_v28 = vld [vmem:[#allocation2 + $0x40] sm:$0xff] (!%p1130_p12)  ;;  %v680_v45 = vld [vmem:[#allocation2 + $0x18] sm:$0xff] (!%p1130_p12)  ;;  %v1185_v4 = vunpack.c.h.bf16 (!%p1130_p12), %v1247_v56  ;;  %1386 = vmatpush3.bf16.msra.mxu1 (!%p1130_p12), %v1466_v51 }
 0x13c   : > { %664 = vst [vmem:[#allocation2 + $0x38] sm:$0xff] %v648_v11  ;;  %672 = vst [vmem:[#allocation2 + $0x78] sm:$0xff] %v656_v12  ;;  %v678_v22 = vld [vmem:[#allocation2 + $0x8] sm:$0xff] (!%p1130_p12)  ;;  %v701_v31 = vmax.f32 (!%p1130_p12), %v685_v28, 0.0  ;;  %v687_v48 = vld [vmem:[#allocation2 + $0x50] sm:$0xff] (!%p1130_p12)  ;;  %v696_v52 = vmax.f32 (!%p1130_p12), %v680_v45, 0.0  ;;  %v743_v0 = vmul.f32 (!%p1130_p12), %v1180_v47, %v695_v46 }
 0x13d   : > { %662 = vst [vmem:[#allocation2 + $0x28] sm:$0xff] %v646_v15  ;;  %670 = vst [vmem:[#allocation2 + $0x68] sm:$0xff] %v654_v16  ;;  %v694_v25 = vmax.f32 (!%p1130_p12), %v678_v22, 0.0  ;;  %v686_v29 = vld [vmem:[#allocation2 + $0x48] sm:$0xff] (!%p1130_p12)  ;;  %v741_v35 = vmul.f32 (!%p1130_p12), %v1176_v26, %v693_v24  ;;  %v688_v49 = vld [vmem:[#allocation2 + $0x58] sm:$0xff] (!%p1130_p12)  ;;  %v703_v57 = vmax.f32 (!%p1130_p12), %v687_v48, 0.0 }
 0x13e   : > { %v702_v32 = vmax.f32 %v686_v29, 0.0  ;;  %v749_v38 = vmul.f32 %v1192_v33, %v701_v31  ;;  %v704_v58 = vmax.f32 %v688_v49, 0.0  ;;  %v1251_v63 = vld [vmem:[%s1639_s7 + $0x30] sm:$0xff]   ;;  %v1467_v9 = vld [vmem:[%s1740_s4 + $0x38] sm:$0xff]   ;;  %v744_v10 = vmul.f32 %v1181_v53, %v696_v52 }
 0x13f   : > { %v742_v36 = vmul.f32 %v1177_v27, %v694_v25  ;;  %v1200_v7 = vunpack.c.l.bf16 %v1251_v63  ;;  %v1201_v8 = vunpack.c.h.bf16 %v1251_v63  ;;  %v751_v11 = vmul.f32 %v1196_v59, %v703_v57  ;;  %v1248_v16 = vld [vmem:[%s1639_s7 + $0x18] sm:$0xff]   ;;  %1338 = vmatprep.subr.bf16.mxu0 %v1467_v9  ;;  %1379 = vmatprep.subr.bf16.mxu1 %v1467_v9 }
 0x140   : > { %v750_v39 = vmul.f32 %v1193_v34, %v702_v32  ;;  %v752_v12 = vmul.f32 %v1197_v60, %v704_v58  ;;  %v1252_v22 = vld [vmem:[%s1639_s7 + $0x38] sm:$0xff]   ;;  %v758_v23 = vpack.c.bf16 %v744_v10, %v743_v0  ;;  %v1188_v27 = vunpack.c.l.bf16 %v1248_v16  ;;  %1339 = vmatpush3.bf16.msra.mxu0 %v1467_v9  ;;  %1387 = vmatpush3.bf16.msra.mxu1 %v1467_v9 }
 0x141   : > { %v757_v40 = vpack.c.bf16 %v742_v36, %v741_v35  ;;  %v683_v14 = vld [vmem:[#allocation2 + $0x30] sm:$0xff]  ;;  %v1189_v28 = vunpack.c.h.bf16 %v1248_v16  ;;  %v1204_v31 = vunpack.c.l.bf16 %v1252_v22  ;;  %v1205_v32 = vunpack.c.h.bf16 %v1252_v22 }
 0x142   : > { %v761_v41 = vpack.c.bf16 %v750_v39, %v749_v38  ;;  %v681_v54 = vld [vmem:[#allocation2 + $0x20] sm:$0xff]  ;;  %v691_v20 = vld [vmem:[#allocation2 + $0x70] sm:$0xff]  ;;  %v762_v24 = vpack.c.bf16 %v752_v12, %v751_v11  ;;  %v699_v25 = vmax.f32 %v683_v14, 0.0 }
 0x143   : > { %1340 = vmatprep.mubr.bf16.mxu0 %v757_v40  ;;  %v689_v61 = vld [vmem:[#allocation2 + $0x60] sm:$0xff]  ;;  %v697_v1 = vmax.f32 %v681_v54, 0.0  ;;  %v684_v15 = vld [vmem:[#allocation2 + $0x38] sm:$0xff]  ;;  %v707_v29 = vmax.f32 %v691_v20, 0.0 }
 0x144   : > { %1348 = vmatprep.mubr.bf16.mxu1 %v761_v41  ;;  %v682_v55 = vld [vmem:[#allocation2 + $0x28] sm:$0xff]  ;;  %v705_v5 = vmax.f32 %v689_v61, 0.0  ;;  %v692_v21 = vld [vmem:[#allocation2 + $0x78] sm:$0xff]  ;;  %v700_v26 = vmax.f32 %v684_v15, 0.0  ;;  %v747_v35 = vmul.f32 %v1188_v27, %v699_v25  ;;  %1341 = vmatmul.mubr.bf16.vlgmr.msra.gmra.mrb[0].mxu0 %v758_v23 }
 0x145   : > { %v690_v62 = vld [vmem:[#allocation2 + $0x68] sm:$0xff]  ;;  %v698_v2 = vmax.f32 %v682_v55, 0.0  ;;  %v745_v13 = vmul.f32 %v1184_v3, %v697_v1  ;;  %v708_v30 = vmax.f32 %v692_v21, 0.0  ;;  %1349 = vmatmul.mubr.bf16.vlgmr.msra.gmra.mrb[0].mxu1 %v762_v24  ;;  %v755_v37 = vmul.f32 %v1204_v31, %v707_v29 }
 0x146   : > { %v706_v6 = vmax.f32 %v690_v62, 0.0  ;;  %v753_v18 = vmul.f32 %v1200_v7, %v705_v5  ;;  %v748_v36 = vmul.f32 %v1189_v28, %v700_v26 }
 0x147   : > { %v746_v17 = vmul.f32 %v1185_v4, %v698_v2  ;;  %v756_v38 = vmul.f32 %v1205_v32, %v708_v30 }
 0x148   : > { %v754_v19 = vmul.f32 %v1201_v8, %v706_v6  ;;  %v760_v39 = vpack.c.bf16 %v748_v36, %v747_v35 }
 0x149   : > { %v759_v33 = vpack.c.bf16 %v746_v17, %v745_v13  ;;  %v764_v40 = vpack.c.bf16 %v756_v38, %v755_v37 }
 0x14a   : > { %v763_v34 = vpack.c.bf16 %v754_v19, %v753_v18 }
 0x14b   : > { %1344 = vmatprep.mubr.bf16.mxu0 %v759_v33 }
 0x14c   : > { %1352 = vmatprep.mubr.bf16.mxu1 %v763_v34  ;;  %1345 = vmatmul.mubr.bf16.gmra.mrb[4].mxu0 %v760_v39 }
 0x14d   : > { %1353 = vmatmul.mubr.bf16.gmra.mrb[4].mxu1 %v764_v40 }
 0x217   : > { %v1342_v41 = vpop.f32.mrb[0].mxu0 }
 0x218   : > { %v1350_v42 = vpop.f32.mrb[0].mxu1  ;;  %v863_v43 = vpop.f32.mrb[1].mxu0 }
 0x219   : > { %v895_v44 = vpop.f32.mrb[1].mxu1  ;;  %v1343_v45 = vpop.f32.mrb[2].mxu0 }
 0x21a   : > { %v1351_v46 = vpop.f32.mrb[2].mxu1  ;;  %v1214_v47 = vpack.c.bf16 %v1343_v45, %v1342_v41  ;;  %v866_v49 = vpop.f32.mrb[3].mxu0 }
 0x21b   : > { %v1234_v48 = vpack.c.bf16 %v1351_v46, %v1350_v42  ;;  %v898_v50 = vpop.f32.mrb[3].mxu1  ;;  %v1209_v51 = vpack.c.bf16 %v866_v49, %v863_v43 }
 0x21c   : > { %v1229_v52 = vpack.c.bf16 %v898_v50, %v895_v44  ;;  %1253 = vst [vmem:[%s1644_s10 + $0x8] sm:$0xff] %v1214_v47  }
 0x21d   : > { %1257 = vst [vmem:[%s1644_s10 + $0x28] sm:$0xff] %v1234_v48   ;;  %1210 = vst [vmem:[%s1644_s10] sm:$0xff] %v1209_v51  }
 0x21e   : > { %1256 = vst [vmem:[%s1644_s10 + $0x20] sm:$0xff] %v1229_v52  }
 0x21f   : > { %v1346_v53 = vpop.f32.mrb[4].mxu0 }
 0x220   : > { %v1354_v54 = vpop.f32.mrb[4].mxu1  ;;  %v879_v55 = vpop.f32.mrb[5].mxu0 }
 0x221   : > { %v911_v56 = vpop.f32.mrb[5].mxu1  ;;  %v1347_v57 = vpop.f32.mrb[6].mxu0 }
 0x222   : > { %v1355_v58 = vpop.f32.mrb[6].mxu1  ;;  %v1224_v59 = vpack.c.bf16 %v1347_v57, %v1346_v53  ;;  %v882_v61 = vpop.f32.mrb[7].mxu0 }
 0x223   : > { %v1244_v60 = vpack.c.bf16 %v1355_v58, %v1354_v54  ;;  %v914_v62 = vpop.f32.mrb[7].mxu1  ;;  %v1219_v63 = vpack.c.bf16 %v882_v61, %v879_v55 }
 0x224   : > { %v1239_v0 = vpack.c.bf16 %v914_v62, %v911_v56  ;;  %1255 = vst [vmem:[%s1644_s10 + $0x18] sm:$0xff] %v1224_v59  }
 0x225   : > { %1259 = vst [vmem:[%s1644_s10 + $0x38] sm:$0xff] %v1244_v60   ;;  %1254 = vst [vmem:[%s1644_s10 + $0x10] sm:$0xff] %v1219_v63  }
 0x226   : > { %1258 = vst [vmem:[%s1644_s10 + $0x30] sm:$0xff] %v1239_v0  }
 0x227 PF: > { %s15_s24 = sadd.s32 1, %s1522_s24   ;;  %s1742_s18 = smov %s1502_s19 }
 0x228   : > { %p12_p13 = scmp.ge.s32.totalorder %s15_s24, 6   ;;  %s1743_s19 = smov %s1605_s6 }
 0x229   : > { %s1744_s20 = smov %s1514_s22  ;;  %s1745_s21 = smov %s1518_s23 }
 0x22a   : > { %s1746_s22 = smov %s1749_s25  ;;  %s1747_s23 = smov %s1753_s26 }
 0x22b   :  { %14 = sbr.rel (!%p12_p13) target bundleno = 4 (0x4), region = 128 }

// kernel: gcn_forward.6
= control target key start
LH: loop header
LB: loop body
LE: loop exit
PB: predicated region body
PF: predicated region fallthrough
CT: control target
= control target key end

     0   :  { %s1118_s12 = smov 0   ;;  %s1120_s13 = smov 0   ;;  %s1263_s0 = inlined_call_operand.vmem [shape: bf16[256,256], index: 0, kind: input, shape index: {}]   ;;  %s1264_s1 = inlined_call_operand.vmem [shape: bf16[256,128], index: 1, kind: input, shape index: {}]   ;;  %s1265_s2 = inlined_call_operand.vmem [shape: f32[1,128], index: 2, kind: input, shape index: {}]   ;;  %s1266_s3 = inlined_call_operand.vmem [shape: bf16[256,128], index: 3, kind: output, shape index: {}]  }
   0x1   :  { %s1122_s14 = smov 0   ;;  %s1124_s15 = smov 0  }
   0x2   :  { %s1126_s16 = smov 0   ;;  %s1128_s17 = smov 0  }
   0x3   :  { %s1130_s18 = smov 0  }
   0x4 LB: > { %s22_s19 = sadd.s32 1, %s1088_s16  ;;  %s25_s20 = sadd.s32 1, %s1092_s17  ;;  %s1096_s18 = sphi %s1130_s18, %s13_s18   ;;  %s1092_s17 = sphi %s1128_s17, %s1272_s17   ;;  %s1088_s16 = sphi %s1126_s16, %s1271_s16   ;;  %s1084_s15 = sphi %s1124_s15, %s1270_s15   ;;  %s1080_s14 = sphi %s1122_s14, %s1269_s14   ;;  %s1076_s13 = sphi %s1120_s13, %s1268_s13   ;;  %s1072_s12 = sphi %s1118_s12, %s1267_s12  }
   0x5   : > { %p23_p0 = scmp.ge.s32.totalorder %s22_s19, 2  ;;  %p41_p1 = scmp.ne.s32.totalorder %s1076_s13, %s1072_s12 }
   0x6   : > { %p42_p2 = scmp.eq.s32.totalorder %s1096_s18, 0  ;;  %s34_s24 = sadd.s32 1, %s1076_s13 }
   0x7   : > { %s1274_s19 = smov (%p23_p0, %s22_s19), 0  ;;  %s1276_s20 = smov (!%p23_p0, %s25_s20), %s1092_s17 }
   0x8   : > { %p43_p3 = por %p42_p2, %p41_p1  ;;  %p27_p4 = scmp.ge.s32.totalorder %s1276_s20, 2 }
   0x9   : > { %s30_s21 = ssub.s32 %s1088_s16, %s1274_s19  ;;  %p794_p6 = scmp.ge.s32.totalorder %s1096_s18, 4 }
   0xa   : > { %s1278_s20 = smov (%p27_p4, %s1276_s20), 0 }
   0xb   : > { %s29_s22 = ssub.s32 %s1092_s17, %s1278_s20  ;;  %141 = sbr.rel (%p794_p6) target bundleno = 34 (0x22), region = 24 }
   0xc   : > { %s31_s23 = sor.u32 %s30_s21, %s29_s22 }
   0xd   : > { %p32_p5 = scmp.eq.s32.totalorder %s31_s23, 0 }
   0xf   : > { %s1169_s25 = scalar_select %p32_p5, %s1076_s13, %s34_s24  }
  0x12   : > { %144 = sbr.rel (!%p43_p3) target bundleno = 34 (0x22), region = 28  ;;  %s146_s26 = sand.u32 (%p43_p3), 1, %s1076_s13  }
  0x13   : > { %s842_s27 = sshll.u32 (%p43_p3), %s1092_s17, 5  ;;  %s795_s28 = sshll.u32 (%p43_p3), %s146_s26, 6 }
  0x14   : > { %s151_s29 = sadd.s32 (%p43_p3), %s1088_s16, %s842_s27  ;;  %s148_s7 = scalar_lea.vmem (%p43_p3), [#allocation3], %s795_s28 }
  0x15   : > { %s798_s30 = sshll.u32 (%p43_p3), %s151_s29, 2 }
  0x16   : > { %s1178_s6 = scalar_lea.vmem (%p43_p3), %s1263_s0, %s798_s30 }
  0x17   : > { %v169_v0 = vld [vmem:[%s1178_s6] sm:$0xf] (%p43_p3)  ;;  %v171_v1 = vld [vmem:[%s1178_s6 + $0x8] sm:$0xf] (%p43_p3)  ;;  %v173_v2 = vld [vmem:[%s1178_s6 + $0x10] sm:$0xf] (%p43_p3) }
  0x18   : > { %170 = vst [vmem:[%s148_s7] sm:$0xf] (%p43_p3), %v169_v0  ;;  %172 = vst [vmem:[%s148_s7 + $0x4] sm:$0xf] (%p43_p3), %v171_v1  ;;  %v175_v3 = vld [vmem:[%s1178_s6 + $0x18] sm:$0xf] (%p43_p3) }
  0x19   : > { %174 = vst [vmem:[%s148_s7 + $0x8] sm:$0xf] %v173_v2  ;;  %v177_v4 = vld [vmem:[%s1178_s6 + $0x20] sm:$0xf]  ;;  %v179_v5 = vld [vmem:[%s1178_s6 + $0x28] sm:$0xf] }
  0x1a   : > { %176 = vst [vmem:[%s148_s7 + $0xc] sm:$0xf] %v175_v3  ;;  %178 = vst [vmem:[%s148_s7 + $0x10] sm:$0xf] %v177_v4  ;;  %v181_v6 = vld [vmem:[%s1178_s6 + $0x30] sm:$0xf] }
  0x1b   : > { %180 = vst [vmem:[%s148_s7 + $0x14] sm:$0xf] %v179_v5  ;;  %v183_v7 = vld [vmem:[%s1178_s6 + $0x38] sm:$0xf]  ;;  %v185_v8 = vld [vmem:[%s1178_s6 + $0x40] sm:$0xf] }
  0x1c   : > { %182 = vst [vmem:[%s148_s7 + $0x18] sm:$0xf] %v181_v6  ;;  %184 = vst [vmem:[%s148_s7 + $0x1c] sm:$0xf] %v183_v7  ;;  %v187_v9 = vld [vmem:[%s1178_s6 + $0x48] sm:$0xf] }
  0x1d   : > { %186 = vst [vmem:[%s148_s7 + $0x20] sm:$0xf] %v185_v8  ;;  %v189_v10 = vld [vmem:[%s1178_s6 + $0x50] sm:$0xf]  ;;  %v191_v11 = vld [vmem:[%s1178_s6 + $0x58] sm:$0xf] }
  0x1e   : > { %188 = vst [vmem:[%s148_s7 + $0x24] sm:$0xf] %v187_v9  ;;  %190 = vst [vmem:[%s148_s7 + $0x28] sm:$0xf] %v189_v10  ;;  %v193_v12 = vld [vmem:[%s1178_s6 + $0x60] sm:$0xf] }
  0x1f   : > { %192 = vst [vmem:[%s148_s7 + $0x2c] sm:$0xf] %v191_v11  ;;  %v195_v13 = vld [vmem:[%s1178_s6 + $0x68] sm:$0xf]  ;;  %v197_v14 = vld [vmem:[%s1178_s6 + $0x70] sm:$0xf] }
  0x20   : > { %194 = vst [vmem:[%s148_s7 + $0x30] sm:$0xf] %v193_v12  ;;  %196 = vst [vmem:[%s148_s7 + $0x34] sm:$0xf] %v195_v13  ;;  %v199_v15 = vld [vmem:[%s1178_s6 + $0x78] sm:$0xf] }
  0x21   : > { %198 = vst [vmem:[%s148_s7 + $0x38] sm:$0xf] %v197_v14  ;;  %200 = vst [vmem:[%s148_s7 + $0x3c] sm:$0xf] %v199_v15 }
  0x22 PF: > { %p799_p7 = scmp.ge.s32.totalorder %s1096_s18, 1  ;;  %p254_p8 = scmp.lt.s32.totalorder %s1096_s18, 5 }
  0x24   : > { %p255_p9 = pnand %p799_p7, %p254_p8 }
  0x25   : > { %s261_s8 = sand.u32 (!%p255_p9), 1, %s1072_s12   ;;  %s801_s9 = sshll.u32 (!%p255_p9), %s1084_s15, 4 }
  0x26   : > { %258 = sbr.rel (%p255_p9) target bundleno = 331 (0x14b), region = 69  ;;  %s800_s10 = sshll.u32 (!%p255_p9), %s261_s8, 6 }
  0x27   : > { %p286_p10 = scmp.lt.s32.totalorder (!%p255_p9), %s801_s9, 31  ;;  %s1205_s24 = scalar_lea.vmem (!%p255_p9), [#allocation3], %s800_s10 }
  0x28   : > { %p803_p11 = scmp.ne.s32.totalorder (!%p255_p9), %s1080_s14, 0 }
  0x2d   : > { %s1280_s9 = smov (!%p286_p10, %s801_s9), 31  ;;  %295 = sbr.rel (%p803_p11) target bundleno = 55 (0x37), region = 77 }
  0x2e   : > { %s802_s11 = sshll.u32 %s1280_s9, 2  ;;  %v804_v16 = vld [vmem:[%s1265_s2] ss:$0 sm:$0xff] (!%p803_p11) }
  0x2f   : > { %s1203_s23 = scalar_lea.vmem %s1266_s3, %s802_s11  ;;  %303 = vst [vmem:[#allocation2] sm:$0xff] (!%p803_p11), %v804_v16  ;;  %304 = vst [vmem:[#allocation2 + $0x8] sm:$0xff] (!%p803_p11), %v804_v16 }
  0x30   : > { %305 = vst [vmem:[#allocation2 + $0x10] sm:$0xff] (!%p803_p11), %v804_v16  ;;  %306 = vst [vmem:[#allocation2 + $0x18] sm:$0xff] (!%p803_p11), %v804_v16 }
  0x31   : > { %307 = vst [vmem:[#allocation2 + $0x20] sm:$0xff] (!%p803_p11), %v804_v16  ;;  %308 = vst [vmem:[#allocation2 + $0x28] sm:$0xff] (!%p803_p11), %v804_v16 }
  0x32   : > { %309 = vst [vmem:[#allocation2 + $0x30] sm:$0xff] (!%p803_p11), %v804_v16  ;;  %310 = vst [vmem:[#allocation2 + $0x38] sm:$0xff] (!%p803_p11), %v804_v16 }
  0x33   : > { %311 = vst [vmem:[#allocation2 + $0x40] sm:$0xff] (!%p803_p11), %v804_v16  ;;  %312 = vst [vmem:[#allocation2 + $0x48] sm:$0xff] (!%p803_p11), %v804_v16 }
  0x34   : > { %313 = vst [vmem:[#allocation2 + $0x50] sm:$0xff] %v804_v16  ;;  %314 = vst [vmem:[#allocation2 + $0x58] sm:$0xff] %v804_v16 }
  0x35   : > { %315 = vst [vmem:[#allocation2 + $0x60] sm:$0xff] %v804_v16  ;;  %316 = vst [vmem:[#allocation2 + $0x68] sm:$0xff] %v804_v16 }
  0x36   : > { %317 = vst [vmem:[#allocation2 + $0x70] sm:$0xff] %v804_v16  ;;  %318 = vst [vmem:[#allocation2 + $0x78] sm:$0xff] %v804_v16 }
  0x37 PF: > { %s805_s12 = sshll.u32 %s1080_s14, 7  ;;  %v1034_v17 = vld [vmem:[%s1205_s24] sm:$0xff]   ;;  %v1036_v27 = vld [vmem:[%s1205_s24 + $0x8] sm:$0xff]   ;;  %v1038_v29 = vld [vmem:[%s1205_s24 + $0x10] sm:$0xff]   ;;  %p823_p12 = scmp.ne.s32.totalorder %s1080_s14, 1 }
  0x38   : > { %s352_s15 = sshra.s32 %s805_s12, 3  ;;  %v1035_v18 = vld [vmem:[%s1205_s24 + $0x20] sm:$0xff]   ;;  %938 = vmatprep.mubr.bf16.mxu0 %v1034_v17  ;;  %v1037_v28 = vld [vmem:[%s1205_s24 + $0x28] sm:$0xff]   ;;  %v1039_v30 = vld [vmem:[%s1205_s24 + $0x30] sm:$0xff]  }
  0x39   : > { %s806_s28 = sshll.u32 %s352_s15, 2  ;;  %946 = vmatprep.mubr.bf16.mxu1 %v1035_v18  ;;  %v1040_v31 = vld [vmem:[%s1205_s24 + $0x18] sm:$0xff]   ;;  %v320_v35 = vld [vmem:[#allocation2] sm:$0xff]  ;;  %v321_v45 = vld [vmem:[#allocation2 + $0x8] sm:$0xff] }
  0x3a   : > { %s1217_s4 = scalar_lea.vmem %s1264_s1, %s806_s28  ;;  %v1041_v32 = vld [vmem:[%s1205_s24 + $0x38] sm:$0xff]   ;;  %v322_v33 = vld [vmem:[#allocation2 + $0x10] sm:$0xff] }
  0x3b   : > { %v1026_v19 = vld [vmem:[%s1217_s4] sm:$0xff]   ;;  %v1027_v20 = vld [vmem:[%s1217_s4 + $0x8] sm:$0xff]   ;;  %v1028_v21 = vld [vmem:[%s1217_s4 + $0x10] sm:$0xff]  }
  0x3c   : > { %922 = vmatprep.subr.bf16.mxu0 %v1026_v19  ;;  %954 = vmatprep.subr.bf16.mxu1 %v1026_v19  ;;  %v1029_v22 = vld [vmem:[%s1217_s4 + $0x18] sm:$0xff]   ;;  %v1030_v23 = vld [vmem:[%s1217_s4 + $0x20] sm:$0xff]   ;;  %v1031_v24 = vld [vmem:[%s1217_s4 + $0x28] sm:$0xff]  }
  0x3d   : > { %923 = vmatpush3.bf16.msra.mxu0 %v1026_v19  ;;  %962 = vmatpush3.bf16.msra.mxu1 %v1026_v19  ;;  %v1032_v25 = vld [vmem:[%s1217_s4 + $0x30] sm:$0xff]   ;;  %v1033_v26 = vld [vmem:[%s1217_s4 + $0x38] sm:$0xff]   ;;  %v328_v36 = vld [vmem:[#allocation2 + $0x40] sm:$0xff] }
  0x3e   : > { %924 = vmatprep.subr.bf16.mxu0 %v1027_v20  ;;  %955 = vmatprep.subr.bf16.mxu1 %v1027_v20  ;;  %v330_v34 = vld [vmem:[#allocation2 + $0x50] sm:$0xff]  ;;  %v323_v39 = vld [vmem:[#allocation2 + $0x18] sm:$0xff]  ;;  %v329_v46 = vld [vmem:[#allocation2 + $0x48] sm:$0xff] }
  0x3f   : > { %v331_v40 = vld [vmem:[#allocation2 + $0x58] sm:$0xff]  ;;  %v326_v57 = vld [vmem:[#allocation2 + $0x30] sm:$0xff]  ;;  %v324_v59 = vld [vmem:[#allocation2 + $0x20] sm:$0xff] }
  0x40   : > { %v334_v58 = vld [vmem:[#allocation2 + $0x70] sm:$0xff]  ;;  %v332_v60 = vld [vmem:[#allocation2 + $0x60] sm:$0xff]  ;;  %v327_v63 = vld [vmem:[#allocation2 + $0x38] sm:$0xff] }
  0x41   : > { %925 = vmatpush3.bf16.msra.mxu0 %v1027_v20  ;;  %963 = vmatpush3.bf16.msra.mxu1 %v1027_v20  ;;  %v335_v0 = vld [vmem:[#allocation2 + $0x78] sm:$0xff]  ;;  %v325_v5 = vld [vmem:[#allocation2 + $0x28] sm:$0xff] }
  0x42   : > { %926 = vmatprep.subr.bf16.mxu0 %v1028_v21  ;;  %956 = vmatprep.subr.bf16.mxu1 %v1028_v21  ;;  %v333_v6 = vld [vmem:[#allocation2 + $0x68] sm:$0xff] }
  0x45   : > { %927 = vmatpush3.bf16.msra.mxu0 %v1028_v21  ;;  %964 = vmatpush3.bf16.msra.mxu1 %v1028_v21 }
  0x46   : > { %928 = vmatprep.subr.bf16.mxu0 %v1029_v22  ;;  %957 = vmatprep.subr.bf16.mxu1 %v1029_v22 }
  0x49   : > { %929 = vmatpush3.bf16.msra.mxu0 %v1029_v22  ;;  %965 = vmatpush3.bf16.msra.mxu1 %v1029_v22 }
  0x4a   : > { %930 = vmatprep.subr.bf16.mxu0 %v1030_v23  ;;  %958 = vmatprep.subr.bf16.mxu1 %v1030_v23 }
  0x4d   : > { %931 = vmatpush3.bf16.msra.mxu0 %v1030_v23  ;;  %966 = vmatpush3.bf16.msra.mxu1 %v1030_v23 }
  0x4e   : > { %932 = vmatprep.subr.bf16.mxu0 %v1031_v24  ;;  %959 = vmatprep.subr.bf16.mxu1 %v1031_v24 }
  0x51   : > { %933 = vmatpush3.bf16.msra.mxu0 %v1031_v24  ;;  %967 = vmatpush3.bf16.msra.mxu1 %v1031_v24 }
  0x52   : > { %934 = vmatprep.subr.bf16.mxu0 %v1032_v25  ;;  %960 = vmatprep.subr.bf16.mxu1 %v1032_v25 }
  0x55   : > { %935 = vmatpush3.bf16.msra.mxu0 %v1032_v25  ;;  %968 = vmatpush3.bf16.msra.mxu1 %v1032_v25 }
  0x56   : > { %936 = vmatprep.subr.bf16.mxu0 %v1033_v26  ;;  %961 = vmatprep.subr.bf16.mxu1 %v1033_v26 }
  0x59   : > { %937 = vmatpush3.bf16.msra.mxu0 %v1033_v26  ;;  %969 = vmatpush3.bf16.msra.mxu1 %v1033_v26 }
  0x5c   : > { %939 = vmatmul.mubr.bf16.vlgmr.msra.gmra.mrb[0].mxu0 %v1036_v27  ;;  %947 = vmatmul.mubr.bf16.vlgmr.msra.gmra.mrb[0].mxu1 %v1037_v28 }
  0x5d   : > { %942 = vmatprep.mubr.bf16.mxu0 %v1038_v29  ;;  %950 = vmatprep.mubr.bf16.mxu1 %v1039_v30 }
  0x64   : > { %943 = vmatmul.mubr.bf16.gmra.mrb[4].mxu0 %v1040_v31  ;;  %951 = vmatmul.mubr.bf16.gmra.mrb[4].mxu1 %v1041_v32 }
 0x12f   : > { %v940_v37 = vpop.f32.mrb[0].mxu0  ;;  %v948_v38 = vpop.f32.mrb[0].mxu1 }
 0x130   : > { %v567_v41 = vadd.f32 %v940_v37, %v322_v33  ;;  %v575_v42 = vadd.f32 %v948_v38, %v330_v34  ;;  %v502_v43 = vpop.f32.mrb[1].mxu0  ;;  %v534_v44 = vpop.f32.mrb[1].mxu1 }
 0x131   : > { %v565_v47 = vadd.f32 %v502_v43, %v320_v35  ;;  %v573_v48 = vadd.f32 %v534_v44, %v328_v36  ;;  %v941_v49 = vpop.f32.mrb[2].mxu0  ;;  %v949_v50 = vpop.f32.mrb[2].mxu1 }
 0x132   : > { %583 = vst [vmem:[#allocation2 + $0x10] sm:$0xff] %v567_v41  ;;  %591 = vst [vmem:[#allocation2 + $0x50] sm:$0xff] %v575_v42  ;;  %v568_v51 = vadd.f32 %v941_v49, %v323_v39  ;;  %v576_v52 = vadd.f32 %v949_v50, %v331_v40  ;;  %v505_v53 = vpop.f32.mrb[3].mxu0  ;;  %v537_v54 = vpop.f32.mrb[3].mxu1 }
 0x133   : > { %581 = vst [vmem:[#allocation2] sm:$0xff] %v565_v47  ;;  %589 = vst [vmem:[#allocation2 + $0x40] sm:$0xff] %v573_v48  ;;  %v566_v55 = vadd.f32 %v505_v53, %v321_v45  ;;  %v574_v56 = vadd.f32 %v537_v54, %v329_v46 }
 0x134   : > { %584 = vst [vmem:[#allocation2 + $0x18] sm:$0xff] %v568_v51  ;;  %592 = vst [vmem:[#allocation2 + $0x58] sm:$0xff] %v576_v52 }
 0x135   : > { %582 = vst [vmem:[#allocation2 + $0x8] sm:$0xff] %v566_v55  ;;  %590 = vst [vmem:[#allocation2 + $0x48] sm:$0xff] %v574_v56 }
 0x137   : > { %v944_v61 = vpop.f32.mrb[4].mxu0  ;;  %v952_v62 = vpop.f32.mrb[4].mxu1  ;;  %600 = sbr.rel (%p823_p12) target bundleno = 331 (0x14b), region = 81 }
 0x138   : > { %v571_v1 = vadd.f32 %v944_v61, %v326_v57  ;;  %v579_v2 = vadd.f32 %v952_v62, %v334_v58  ;;  %v518_v3 = vpop.f32.mrb[5].mxu0  ;;  %v550_v4 = vpop.f32.mrb[5].mxu1 }
 0x139   : > { %v569_v7 = vadd.f32 %v518_v3, %v324_v59  ;;  %v577_v8 = vadd.f32 %v550_v4, %v332_v60  ;;  %v945_v9 = vpop.f32.mrb[6].mxu0  ;;  %v953_v10 = vpop.f32.mrb[6].mxu1  ;;  %v603_v19 = vld [vmem:[#allocation2 + $0x10] sm:$0xff] (!%p823_p12) }
 0x13a   : > { %587 = vst [vmem:[#allocation2 + $0x30] sm:$0xff] %v571_v1  ;;  %595 = vst [vmem:[#allocation2 + $0x70] sm:$0xff] %v579_v2  ;;  %v572_v11 = vadd.f32 %v945_v9, %v327_v63  ;;  %v580_v12 = vadd.f32 %v953_v10, %v335_v0  ;;  %v521_v13 = vpop.f32.mrb[7].mxu0  ;;  %v553_v14 = vpop.f32.mrb[7].mxu1  ;;  %v601_v17 = vld [vmem:[#allocation2] sm:$0xff] (!%p823_p12)  ;;  %v619_v23 = vmax.f32 (!%p823_p12), %v603_v19, 0.0 }
 0x13b   : > { %585 = vst [vmem:[#allocation2 + $0x20] sm:$0xff] %v569_v7  ;;  %593 = vst [vmem:[#allocation2 + $0x60] sm:$0xff] %v577_v8  ;;  %v570_v15 = vadd.f32 %v521_v13, %v325_v5  ;;  %v578_v16 = vadd.f32 %v553_v14, %v333_v6  ;;  %v617_v20 = vmax.f32 (!%p823_p12), %v601_v17, 0.0  ;;  %v604_v22 = vld [vmem:[#allocation2 + $0x18] sm:$0xff] (!%p823_p12)  ;;  %v609_v31 = vld [vmem:[#allocation2 + $0x40] sm:$0xff] (!%p823_p12) }
 0x13c   : > { %588 = vst [vmem:[#allocation2 + $0x38] sm:$0xff] %v572_v11  ;;  %596 = vst [vmem:[#allocation2 + $0x78] sm:$0xff] %v580_v12  ;;  %v602_v18 = vld [vmem:[#allocation2 + $0x8] sm:$0xff] (!%p823_p12)  ;;  %v620_v26 = vmax.f32 (!%p823_p12), %v604_v22, 0.0  ;;  %v625_v36 = vmax.f32 (!%p823_p12), %v609_v31, 0.0  ;;  %v611_v37 = vld [vmem:[#allocation2 + $0x50] sm:$0xff] (!%p823_p12) }
 0x13d   : > { %586 = vst [vmem:[#allocation2 + $0x28] sm:$0xff] %v570_v15  ;;  %594 = vst [vmem:[#allocation2 + $0x68] sm:$0xff] %v578_v16  ;;  %v618_v21 = vmax.f32 (!%p823_p12), %v602_v18, 0.0  ;;  %v610_v35 = vld [vmem:[#allocation2 + $0x48] sm:$0xff] (!%p823_p12)  ;;  %v612_v38 = vld [vmem:[#allocation2 + $0x58] sm:$0xff] (!%p823_p12)  ;;  %v627_v42 = vmax.f32 (!%p823_p12), %v611_v37, 0.0 }
 0x13e   : > { %v867_v39 = vpack.c.bf16 %v620_v26, %v619_v23  ;;  %v626_v41 = vmax.f32 %v610_v35, 0.0  ;;  %v628_v47 = vmax.f32 %v612_v38, 0.0 }
 0x13f   : > { %v862_v32 = vpack.c.bf16 %v618_v21, %v617_v20 }
 0x140   : > { %899 = vst [vmem:[%s1203_s23 + $0x8] sm:$0xff] %v867_v39   ;;  %v882_v51 = vpack.c.bf16 %v626_v41, %v625_v36  ;;  %v887_v54 = vpack.c.bf16 %v628_v47, %v627_v42 }
 0x141   : > { %v607_v29 = vld [vmem:[#allocation2 + $0x30] sm:$0xff]  ;;  %863 = vst [vmem:[%s1203_s23] sm:$0xff] %v862_v32  }
 0x142   : > { %v605_v24 = vld [vmem:[#allocation2 + $0x20] sm:$0xff]  ;;  %v623_v33 = vmax.f32 %v607_v29, 0.0  ;;  %v615_v45 = vld [vmem:[#allocation2 + $0x70] sm:$0xff]  ;;  %902 = vst [vmem:[%s1203_s23 + $0x20] sm:$0xff] %v882_v51   ;;  %903 = vst [vmem:[%s1203_s23 + $0x28] sm:$0xff] %v887_v54  }
 0x143   : > { %v621_v27 = vmax.f32 %v605_v24, 0.0  ;;  %v608_v30 = vld [vmem:[#allocation2 + $0x38] sm:$0xff]  ;;  %v613_v43 = vld [vmem:[#allocation2 + $0x60] sm:$0xff]  ;;  %v631_v52 = vmax.f32 %v615_v45, 0.0 }
 0x144   : > { %v606_v25 = vld [vmem:[#allocation2 + $0x28] sm:$0xff]  ;;  %v624_v34 = vmax.f32 %v608_v30, 0.0  ;;  %v629_v48 = vmax.f32 %v613_v43, 0.0  ;;  %v616_v50 = vld [vmem:[#allocation2 + $0x78] sm:$0xff] }
 0x145   : > { %v622_v28 = vmax.f32 %v606_v25, 0.0  ;;  %v614_v44 = vld [vmem:[#allocation2 + $0x68] sm:$0xff]  ;;  %v632_v53 = vmax.f32 %v616_v50, 0.0 }
 0x146   : > { %v877_v46 = vpack.c.bf16 %v624_v34, %v623_v33  ;;  %v630_v49 = vmax.f32 %v614_v44, 0.0 }
 0x147   : > { %v872_v40 = vpack.c.bf16 %v622_v28, %v621_v27  ;;  %v897_v56 = vpack.c.bf16 %v632_v53, %v631_v52 }
 0x148   : > { %901 = vst [vmem:[%s1203_s23 + $0x18] sm:$0xff] %v877_v46   ;;  %v892_v55 = vpack.c.bf16 %v630_v49, %v629_v48 }
 0x149   : > { %900 = vst [vmem:[%s1203_s23 + $0x10] sm:$0xff] %v872_v40   ;;  %905 = vst [vmem:[%s1203_s23 + $0x38] sm:$0xff] %v897_v56  }
 0x14a   : > { %904 = vst [vmem:[%s1203_s23 + $0x30] sm:$0xff] %v892_v55  }
 0x14b PF: > { %s13_s18 = sadd.s32 1, %s1096_s18   ;;  %s1267_s12 = smov %s1076_s13 }
 0x14c   : > { %p10_p13 = scmp.ge.s32.totalorder %s13_s18, 6   ;;  %s1268_s13 = smov %s1169_s25 }
 0x14d   : > { %s1269_s14 = smov %s1088_s16  ;;  %s1270_s15 = smov %s1092_s17 }
 0x14e   : > { %s1271_s16 = smov %s1274_s19  ;;  %s1272_s17 = smov %s1278_s20 }
 0x14f   :  { %12 = sbr.rel (!%p10_p13) target bundleno = 4 (0x4), region = 117 }

</bundles_post_ra>
